<compile_context>
chip_gen: v6e
topology: v6e:2x2x1
jax: 0.10.0
libtpu: 0.0.40
codegen_flags: <defaults>
</compile_context>

<pallas_src>
import functools

import jax
import jax.numpy as jnp
from jax import lax
from jax.experimental import pallas as pl
from jax.experimental.pallas import tpu as pltpu


def _gene_attention_kernel(x_ref, wqkv_ref, bqkv_ref, wo_ref, bo_ref, o_ref,
                           *, heads, head_dim, scale):
    feat = heads * head_dim
    x = x_ref[...]                                            # (S, F)

    # Fused QKV projection: single lane-dense N = 3*F MXU matmul.
    qkv = jnp.dot(x, wqkv_ref[...], preferred_element_type=jnp.float32)
    qkv = qkv + bqkv_ref[...]                                 # (S, 3F)

    # Per-head attention. Static (unrolled) loop; all slices are static
    # lane slices of the live qkv vregs — no extra MXU passes or DMAs.
    head_outs = []
    for h in range(heads):
        lo = h * head_dim
        qh = qkv[:, lo:lo + head_dim]                                  # (S, hd)
        kh = qkv[:, feat + lo:feat + lo + head_dim]                    # (S, hd)
        vh = qkv[:, 2 * feat + lo:2 * feat + lo + head_dim]            # (S, hd)

        # scores = (q @ k^T) * scale  — contract head_dim of both operands.
        s = lax.dot_general(qh, kh, (((1,), (1,)), ((), ())),
                            preferred_element_type=jnp.float32) * scale
        # numerically stable softmax over keys (kept in f32)
        s = s - jnp.max(s, axis=-1, keepdims=True)
        p = jnp.exp(s)
        p = p / jnp.sum(p, axis=-1, keepdims=True)
        head_outs.append(jnp.dot(p, vh, preferred_element_type=jnp.float32))

    attn_out = jnp.concatenate(head_outs, axis=-1)            # (S, F), lane-dense

    # Output projection.
    out = jnp.dot(attn_out, wo_ref[...], preferred_element_type=jnp.float32)
    out = out + bo_ref[...]
    o_ref[...] = out.astype(o_ref.dtype)


def gene_attention_forward(x, params, heads):
    """x: (batch, seq, feature_dim) -> (batch, seq, feature_dim)."""
    B, S, F = x.shape
    assert F % heads == 0
    head_dim = F // heads
    scale = float(head_dim) ** -0.5

    # Glue (outside the kernel): fuse the three projection weights into one
    # (F, 3F) matrix so the kernel issues a single lane-dense matmul.
    wqkv = jnp.concatenate([params["wq"], params["wk"], params["wv"]], axis=1)
    bqkv = jnp.concatenate([params["bq"], params["bk"], params["bv"]],
                           axis=0).reshape(1, 3 * F)
    wo = params["wo"]
    bo = params["bo"].reshape(1, F)

    kernel = functools.partial(_gene_attention_kernel,
                               heads=heads, head_dim=head_dim, scale=scale)

    # Advisory cost hint for XLA scheduling around this small kernel.
    flops = B * (2 * S * F * (3 * F)          # fused QKV projection
                 + 4 * S * S * F              # scores + attn @ v (all heads)
                 + 2 * S * F * F)             # output projection
    transcendentals = B * heads * S * S       # exp in softmax
    bytes_accessed = 4 * (x.size + wqkv.size + bqkv.size + wo.size + bo.size
                          + B * S * F)

    out = pl.pallas_call(
        kernel,
        out_shape=jax.ShapeDtypeStruct((B, S, F), x.dtype),
        grid=(B,),
        in_specs=[
            # x tile streams per grid step (batch dim squeezed out).
            pl.BlockSpec((None, S, F), lambda b: (b, 0, 0)),
            # Weights / biases: constant index maps -> stay VMEM-resident.
            pl.BlockSpec((F, 3 * F), lambda b: (0, 0)),
            pl.BlockSpec((1, 3 * F), lambda b: (0, 0)),
            pl.BlockSpec((F, F), lambda b: (0, 0)),
            pl.BlockSpec((1, F), lambda b: (0, 0)),
        ],
        out_specs=pl.BlockSpec((None, S, F), lambda b: (b, 0, 0)),
        compiler_params=pltpu.CompilerParams(
            dimension_semantics=("parallel",)),
        cost_estimate=pl.CostEstimate(
            flops=flops,
            transcendentals=transcendentals,
            bytes_accessed=bytes_accessed),
    )(x, wqkv, bqkv, wo, bo)
    return out


def init_params(key, feature_dim):
    ks = jax.random.split(key, 8)
    sd = feature_dim ** -0.5

    def lin(kw, kb):
        w = jax.random.normal(kw, (feature_dim, feature_dim), jnp.float32) * sd
        b = jax.random.normal(kb, (feature_dim,), jnp.float32) * 0.01
        return w, b

    wq, bq = lin(ks[0], ks[1])
    wk, bk = lin(ks[2], ks[3])
    wv, bv = lin(ks[4], ks[5])
    wo, bo = lin(ks[6], ks[7])
    return dict(wq=wq, bq=bq, wk=wk, bk=bk, wv=wv, bv=bv, wo=wo, bo=bo)


def _reference(x, params, heads):
    """Pure-JAX mirror of the PyTorch GeneAttention.forward."""
    B, S, F = x.shape
    hd = F // heads
    q = x @ params["wq"] + params["bq"]
    k = x @ params["wk"] + params["bk"]
    v = x @ params["wv"] + params["bv"]

    def split(t):
        return t.reshape(B, S, heads, hd).transpose(0, 2, 1, 3)

    qh, kh, vh = split(q), split(k), split(v)
    scores = jnp.einsum("bhqd,bhkd->bhqk", qh, kh) * (hd ** -0.5)
    attn = jax.nn.softmax(scores, axis=-1)
    out = jnp.einsum("bhqk,bhkd->bhqd", attn, vh)
    out = out.transpose(0, 2, 1, 3).reshape(B, S, F)
    return out @ params["wo"] + params["bo"]


if __name__ == "__main__":
    # Use full-f32 matmuls everywhere (kernel + reference) so the numeric
    # comparison is not polluted by default bf16-pass matmul precision.
    jax.config.update("jax_default_matmul_precision", "highest")

    key = jax.random.PRNGKey(0)
    kx, kp = jax.random.split(key)

    batch, seq, feature_dim, heads = 2, 8, 32, 8
    x = jax.random.normal(kx, (batch, seq, feature_dim), jnp.float32)
    params = init_params(kp, feature_dim)

    out = gene_attention_forward(x, params, heads)
    jax.block_until_ready(out)

    ref = _reference(x, params, heads)
    assert out.shape == (batch, seq, feature_dim)
    assert jnp.allclose(out, ref, atol=1e-4, rtol=1e-4), float(
        jnp.max(jnp.abs(out - ref)))

    print("KERNEL_OK")
</pallas_src>

<mosaic_0001>
module attributes {stable_mosaic.version = 11 : i64} {
  func.func @_gene_attention_kernel(%arg0: i32, %arg1: memref<1x8x32xf32, #tpu.memory_space<vmem>>, %arg2: memref<32x96xf32, #tpu.memory_space<vmem>>, %arg3: memref<1x96xf32, #tpu.memory_space<vmem>>, %arg4: memref<32x32xf32, #tpu.memory_space<vmem>>, %arg5: memref<1x32xf32, #tpu.memory_space<vmem>>, %arg6: memref<1x8x32xf32, #tpu.memory_space<vmem>>) attributes {dimension_semantics = [#tpu.dimension_semantics<parallel>], iteration_bounds = array<i64: 2>, scalar_prefetch = 0 : i64, scratch_operands = 0 : i64, tpu.core_type = #tpu.core_type<tc>, window_params = [{transform_indices = @transform_0, window_bounds = array<i64: 1, 8, 32>}, {pipeline_mode = #tpu.pipeline_mode<synchronous>, transform_indices = @transform_1, window_bounds = array<i64: 32, 96>}, {pipeline_mode = #tpu.pipeline_mode<synchronous>, transform_indices = @transform_2, window_bounds = array<i64: 1, 96>}, {pipeline_mode = #tpu.pipeline_mode<synchronous>, transform_indices = @transform_3, window_bounds = array<i64: 32, 32>}, {pipeline_mode = #tpu.pipeline_mode<synchronous>, transform_indices = @transform_4, window_bounds = array<i64: 1, 32>}, {transform_indices = @transform_5, window_bounds = array<i64: 1, 8, 32>}]} {
    %c0 = arith.constant 0 : index
    %c0_0 = arith.constant 0 : index
    %c0_1 = arith.constant 0 : index
    %0 = vector.load %arg1[%c0, %c0_0, %c0_1] : memref<1x8x32xf32, #tpu.memory_space<vmem>>, vector<1x8x32xf32>
    %1 = vector.shape_cast %0 : vector<1x8x32xf32> to vector<8x32xf32>
    %c0_2 = arith.constant 0 : index
    %c0_3 = arith.constant 0 : index
    %2 = vector.load %arg2[%c0_2, %c0_3] : memref<32x96xf32, #tpu.memory_space<vmem>>, vector<32x96xf32>
    %cst = arith.constant dense<0.000000e+00> : vector<8x96xf32>
    %3 = tpu.matmul %1, %2, %cst {dimension_numbers = #tpu.dot_dimension_numbers<[1], [0], [0], [1], [0, 0, 1, 1], [], []>, precision = #tpu.contract_precision<fp32>} : vector<8x32xf32>, vector<32x96xf32>, vector<8x96xf32> -> vector<8x96xf32>
    %c0_4 = arith.constant 0 : index
    %c0_5 = arith.constant 0 : index
    %4 = vector.load %arg3[%c0_4, %c0_5] : memref<1x96xf32, #tpu.memory_space<vmem>>, vector<1x96xf32>
    %5 = vector.broadcast %4 : vector<1x96xf32> to vector<8x96xf32>
    %6 = arith.addf %3, %5 : vector<8x96xf32>
    %7 = vector.extract_strided_slice %6 {offsets = [0, 0], sizes = [8, 4], strides = [1, 1]} : vector<8x96xf32> to vector<8x4xf32>
    %8 = vector.extract_strided_slice %6 {offsets = [0, 32], sizes = [8, 4], strides = [1, 1]} : vector<8x96xf32> to vector<8x4xf32>
    %9 = vector.extract_strided_slice %6 {offsets = [0, 64], sizes = [8, 4], strides = [1, 1]} : vector<8x96xf32> to vector<8x4xf32>
    %cst_6 = arith.constant dense<0.000000e+00> : vector<8x8xf32>
    %10 = tpu.matmul %7, %8, %cst_6 {dimension_numbers = #tpu.dot_dimension_numbers<[1], [1], [0], [0], [0, 0, 1, 0], [], []>, precision = #tpu.contract_precision<fp32>} : vector<8x4xf32>, vector<8x4xf32>, vector<8x8xf32> -> vector<8x8xf32>
    %cst_7 = arith.constant 5.000000e-01 : f32
    %11 = vector.broadcast %cst_7 : f32 to vector<8x8xf32>
    %12 = arith.mulf %10, %11 : vector<8x8xf32>
    %cst_8 = arith.constant dense<0xFF800000> : vector<8xf32>
    %13 = vector.multi_reduction <maximumf>, %12, %cst_8 [1] : vector<8x8xf32> to vector<8xf32>
    %14 = vector.shape_cast %13 : vector<8xf32> to vector<8x1xf32>
    %15 = vector.broadcast %14 : vector<8x1xf32> to vector<8x8xf32>
    %16 = arith.subf %12, %15 : vector<8x8xf32>
    %17 = math.exp %16 : vector<8x8xf32>
    %cst_9 = arith.constant dense<0.000000e+00> : vector<8xf32>
    %18 = vector.multi_reduction <add>, %17, %cst_9 [1] : vector<8x8xf32> to vector<8xf32>
    %19 = vector.shape_cast %18 : vector<8xf32> to vector<8x1xf32>
    %20 = vector.broadcast %19 : vector<8x1xf32> to vector<8x8xf32>
    %21 = arith.divf %17, %20 : vector<8x8xf32>
    %cst_10 = arith.constant dense<0.000000e+00> : vector<8x4xf32>
    %22 = tpu.matmul %21, %9, %cst_10 {dimension_numbers = #tpu.dot_dimension_numbers<[1], [0], [0], [1], [0, 0, 1, 1], [], []>, precision = #tpu.contract_precision<fp32>} : vector<8x8xf32>, vector<8x4xf32>, vector<8x4xf32> -> vector<8x4xf32>
    %23 = vector.extract_strided_slice %6 {offsets = [0, 4], sizes = [8, 4], strides = [1, 1]} : vector<8x96xf32> to vector<8x4xf32>
    %24 = vector.extract_strided_slice %6 {offsets = [0, 36], sizes = [8, 4], strides = [1, 1]} : vector<8x96xf32> to vector<8x4xf32>
    %25 = vector.extract_strided_slice %6 {offsets = [0, 68], sizes = [8, 4], strides = [1, 1]} : vector<8x96xf32> to vector<8x4xf32>
    %cst_11 = arith.constant dense<0.000000e+00> : vector<8x8xf32>
    %26 = tpu.matmul %23, %24, %cst_11 {dimension_numbers = #tpu.dot_dimension_numbers<[1], [1], [0], [0], [0, 0, 1, 0], [], []>, precision = #tpu.contract_precision<fp32>} : vector<8x4xf32>, vector<8x4xf32>, vector<8x8xf32> -> vector<8x8xf32>
    %cst_12 = arith.constant 5.000000e-01 : f32
    %27 = vector.broadcast %cst_12 : f32 to vector<8x8xf32>
    %28 = arith.mulf %26, %27 : vector<8x8xf32>
    %cst_13 = arith.constant dense<0xFF800000> : vector<8xf32>
    %29 = vector.multi_reduction <maximumf>, %28, %cst_13 [1] : vector<8x8xf32> to vector<8xf32>
    %30 = vector.shape_cast %29 : vector<8xf32> to vector<8x1xf32>
    %31 = vector.broadcast %30 : vector<8x1xf32> to vector<8x8xf32>
    %32 = arith.subf %28, %31 : vector<8x8xf32>
    %33 = math.exp %32 : vector<8x8xf32>
    %cst_14 = arith.constant dense<0.000000e+00> : vector<8xf32>
    %34 = vector.multi_reduction <add>, %33, %cst_14 [1] : vector<8x8xf32> to vector<8xf32>
    %35 = vector.shape_cast %34 : vector<8xf32> to vector<8x1xf32>
    %36 = vector.broadcast %35 : vector<8x1xf32> to vector<8x8xf32>
    %37 = arith.divf %33, %36 : vector<8x8xf32>
    %cst_15 = arith.constant dense<0.000000e+00> : vector<8x4xf32>
    %38 = tpu.matmul %37, %25, %cst_15 {dimension_numbers = #tpu.dot_dimension_numbers<[1], [0], [0], [1], [0, 0, 1, 1], [], []>, precision = #tpu.contract_precision<fp32>} : vector<8x8xf32>, vector<8x4xf32>, vector<8x4xf32> -> vector<8x4xf32>
    %39 = vector.extract_strided_slice %6 {offsets = [0, 8], sizes = [8, 4], strides = [1, 1]} : vector<8x96xf32> to vector<8x4xf32>
    %40 = vector.extract_strided_slice %6 {offsets = [0, 40], sizes = [8, 4], strides = [1, 1]} : vector<8x96xf32> to vector<8x4xf32>
    %41 = vector.extract_strided_slice %6 {offsets = [0, 72], sizes = [8, 4], strides = [1, 1]} : vector<8x96xf32> to vector<8x4xf32>
    %cst_16 = arith.constant dense<0.000000e+00> : vector<8x8xf32>
    %42 = tpu.matmul %39, %40, %cst_16 {dimension_numbers = #tpu.dot_dimension_numbers<[1], [1], [0], [0], [0, 0, 1, 0], [], []>, precision = #tpu.contract_precision<fp32>} : vector<8x4xf32>, vector<8x4xf32>, vector<8x8xf32> -> vector<8x8xf32>
    %cst_17 = arith.constant 5.000000e-01 : f32
    %43 = vector.broadcast %cst_17 : f32 to vector<8x8xf32>
    %44 = arith.mulf %42, %43 : vector<8x8xf32>
    %cst_18 = arith.constant dense<0xFF800000> : vector<8xf32>
    %45 = vector.multi_reduction <maximumf>, %44, %cst_18 [1] : vector<8x8xf32> to vector<8xf32>
    %46 = vector.shape_cast %45 : vector<8xf32> to vector<8x1xf32>
    %47 = vector.broadcast %46 : vector<8x1xf32> to vector<8x8xf32>
    %48 = arith.subf %44, %47 : vector<8x8xf32>
    %49 = math.exp %48 : vector<8x8xf32>
    %cst_19 = arith.constant dense<0.000000e+00> : vector<8xf32>
    %50 = vector.multi_reduction <add>, %49, %cst_19 [1] : vector<8x8xf32> to vector<8xf32>
    %51 = vector.shape_cast %50 : vector<8xf32> to vector<8x1xf32>
    %52 = vector.broadcast %51 : vector<8x1xf32> to vector<8x8xf32>
    %53 = arith.divf %49, %52 : vector<8x8xf32>
    %cst_20 = arith.constant dense<0.000000e+00> : vector<8x4xf32>
    %54 = tpu.matmul %53, %41, %cst_20 {dimension_numbers = #tpu.dot_dimension_numbers<[1], [0], [0], [1], [0, 0, 1, 1], [], []>, precision = #tpu.contract_precision<fp32>} : vector<8x8xf32>, vector<8x4xf32>, vector<8x4xf32> -> vector<8x4xf32>
    %55 = vector.extract_strided_slice %6 {offsets = [0, 12], sizes = [8, 4], strides = [1, 1]} : vector<8x96xf32> to vector<8x4xf32>
    %56 = vector.extract_strided_slice %6 {offsets = [0, 44], sizes = [8, 4], strides = [1, 1]} : vector<8x96xf32> to vector<8x4xf32>
    %57 = vector.extract_strided_slice %6 {offsets = [0, 76], sizes = [8, 4], strides = [1, 1]} : vector<8x96xf32> to vector<8x4xf32>
    %cst_21 = arith.constant dense<0.000000e+00> : vector<8x8xf32>
    %58 = tpu.matmul %55, %56, %cst_21 {dimension_numbers = #tpu.dot_dimension_numbers<[1], [1], [0], [0], [0, 0, 1, 0], [], []>, precision = #tpu.contract_precision<fp32>} : vector<8x4xf32>, vector<8x4xf32>, vector<8x8xf32> -> vector<8x8xf32>
    %cst_22 = arith.constant 5.000000e-01 : f32
    %59 = vector.broadcast %cst_22 : f32 to vector<8x8xf32>
    %60 = arith.mulf %58, %59 : vector<8x8xf32>
    %cst_23 = arith.constant dense<0xFF800000> : vector<8xf32>
    %61 = vector.multi_reduction <maximumf>, %60, %cst_23 [1] : vector<8x8xf32> to vector<8xf32>
    %62 = vector.shape_cast %61 : vector<8xf32> to vector<8x1xf32>
    %63 = vector.broadcast %62 : vector<8x1xf32> to vector<8x8xf32>
    %64 = arith.subf %60, %63 : vector<8x8xf32>
    %65 = math.exp %64 : vector<8x8xf32>
    %cst_24 = arith.constant dense<0.000000e+00> : vector<8xf32>
    %66 = vector.multi_reduction <add>, %65, %cst_24 [1] : vector<8x8xf32> to vector<8xf32>
    %67 = vector.shape_cast %66 : vector<8xf32> to vector<8x1xf32>
    %68 = vector.broadcast %67 : vector<8x1xf32> to vector<8x8xf32>
    %69 = arith.divf %65, %68 : vector<8x8xf32>
    %cst_25 = arith.constant dense<0.000000e+00> : vector<8x4xf32>
    %70 = tpu.matmul %69, %57, %cst_25 {dimension_numbers = #tpu.dot_dimension_numbers<[1], [0], [0], [1], [0, 0, 1, 1], [], []>, precision = #tpu.contract_precision<fp32>} : vector<8x8xf32>, vector<8x4xf32>, vector<8x4xf32> -> vector<8x4xf32>
    %71 = vector.extract_strided_slice %6 {offsets = [0, 16], sizes = [8, 4], strides = [1, 1]} : vector<8x96xf32> to vector<8x4xf32>
    %72 = vector.extract_strided_slice %6 {offsets = [0, 48], sizes = [8, 4], strides = [1, 1]} : vector<8x96xf32> to vector<8x4xf32>
    %73 = vector.extract_strided_slice %6 {offsets = [0, 80], sizes = [8, 4], strides = [1, 1]} : vector<8x96xf32> to vector<8x4xf32>
    %cst_26 = arith.constant dense<0.000000e+00> : vector<8x8xf32>
    %74 = tpu.matmul %71, %72, %cst_26 {dimension_numbers = #tpu.dot_dimension_numbers<[1], [1], [0], [0], [0, 0, 1, 0], [], []>, precision = #tpu.contract_precision<fp32>} : vector<8x4xf32>, vector<8x4xf32>, vector<8x8xf32> -> vector<8x8xf32>
    %cst_27 = arith.constant 5.000000e-01 : f32
    %75 = vector.broadcast %cst_27 : f32 to vector<8x8xf32>
    %76 = arith.mulf %74, %75 : vector<8x8xf32>
    %cst_28 = arith.constant dense<0xFF800000> : vector<8xf32>
    %77 = vector.multi_reduction <maximumf>, %76, %cst_28 [1] : vector<8x8xf32> to vector<8xf32>
    %78 = vector.shape_cast %77 : vector<8xf32> to vector<8x1xf32>
    %79 = vector.broadcast %78 : vector<8x1xf32> to vector<8x8xf32>
    %80 = arith.subf %76, %79 : vector<8x8xf32>
    %81 = math.exp %80 : vector<8x8xf32>
    %cst_29 = arith.constant dense<0.000000e+00> : vector<8xf32>
    %82 = vector.multi_reduction <add>, %81, %cst_29 [1] : vector<8x8xf32> to vector<8xf32>
    %83 = vector.shape_cast %82 : vector<8xf32> to vector<8x1xf32>
    %84 = vector.broadcast %83 : vector<8x1xf32> to vector<8x8xf32>
    %85 = arith.divf %81, %84 : vector<8x8xf32>
    %cst_30 = arith.constant dense<0.000000e+00> : vector<8x4xf32>
    %86 = tpu.matmul %85, %73, %cst_30 {dimension_numbers = #tpu.dot_dimension_numbers<[1], [0], [0], [1], [0, 0, 1, 1], [], []>, precision = #tpu.contract_precision<fp32>} : vector<8x8xf32>, vector<8x4xf32>, vector<8x4xf32> -> vector<8x4xf32>
    %87 = vector.extract_strided_slice %6 {offsets = [0, 20], sizes = [8, 4], strides = [1, 1]} : vector<8x96xf32> to vector<8x4xf32>
    %88 = vector.extract_strided_slice %6 {offsets = [0, 52], sizes = [8, 4], strides = [1, 1]} : vector<8x96xf32> to vector<8x4xf32>
    %89 = vector.extract_strided_slice %6 {offsets = [0, 84], sizes = [8, 4], strides = [1, 1]} : vector<8x96xf32> to vector<8x4xf32>
    %cst_31 = arith.constant dense<0.000000e+00> : vector<8x8xf32>
    %90 = tpu.matmul %87, %88, %cst_31 {dimension_numbers = #tpu.dot_dimension_numbers<[1], [1], [0], [0], [0, 0, 1, 0], [], []>, precision = #tpu.contract_precision<fp32>} : vector<8x4xf32>, vector<8x4xf32>, vector<8x8xf32> -> vector<8x8xf32>
    %cst_32 = arith.constant 5.000000e-01 : f32
    %91 = vector.broadcast %cst_32 : f32 to vector<8x8xf32>
    %92 = arith.mulf %90, %91 : vector<8x8xf32>
    %cst_33 = arith.constant dense<0xFF800000> : vector<8xf32>
    %93 = vector.multi_reduction <maximumf>, %92, %cst_33 [1] : vector<8x8xf32> to vector<8xf32>
    %94 = vector.shape_cast %93 : vector<8xf32> to vector<8x1xf32>
    %95 = vector.broadcast %94 : vector<8x1xf32> to vector<8x8xf32>
    %96 = arith.subf %92, %95 : vector<8x8xf32>
    %97 = math.exp %96 : vector<8x8xf32>
    %cst_34 = arith.constant dense<0.000000e+00> : vector<8xf32>
    %98 = vector.multi_reduction <add>, %97, %cst_34 [1] : vector<8x8xf32> to vector<8xf32>
    %99 = vector.shape_cast %98 : vector<8xf32> to vector<8x1xf32>
    %100 = vector.broadcast %99 : vector<8x1xf32> to vector<8x8xf32>
    %101 = arith.divf %97, %100 : vector<8x8xf32>
    %cst_35 = arith.constant dense<0.000000e+00> : vector<8x4xf32>
    %102 = tpu.matmul %101, %89, %cst_35 {dimension_numbers = #tpu.dot_dimension_numbers<[1], [0], [0], [1], [0, 0, 1, 1], [], []>, precision = #tpu.contract_precision<fp32>} : vector<8x8xf32>, vector<8x4xf32>, vector<8x4xf32> -> vector<8x4xf32>
    %103 = vector.extract_strided_slice %6 {offsets = [0, 24], sizes = [8, 4], strides = [1, 1]} : vector<8x96xf32> to vector<8x4xf32>
    %104 = vector.extract_strided_slice %6 {offsets = [0, 56], sizes = [8, 4], strides = [1, 1]} : vector<8x96xf32> to vector<8x4xf32>
    %105 = vector.extract_strided_slice %6 {offsets = [0, 88], sizes = [8, 4], strides = [1, 1]} : vector<8x96xf32> to vector<8x4xf32>
    %cst_36 = arith.constant dense<0.000000e+00> : vector<8x8xf32>
    %106 = tpu.matmul %103, %104, %cst_36 {dimension_numbers = #tpu.dot_dimension_numbers<[1], [1], [0], [0], [0, 0, 1, 0], [], []>, precision = #tpu.contract_precision<fp32>} : vector<8x4xf32>, vector<8x4xf32>, vector<8x8xf32> -> vector<8x8xf32>
    %cst_37 = arith.constant 5.000000e-01 : f32
    %107 = vector.broadcast %cst_37 : f32 to vector<8x8xf32>
    %108 = arith.mulf %106, %107 : vector<8x8xf32>
    %cst_38 = arith.constant dense<0xFF800000> : vector<8xf32>
    %109 = vector.multi_reduction <maximumf>, %108, %cst_38 [1] : vector<8x8xf32> to vector<8xf32>
    %110 = vector.shape_cast %109 : vector<8xf32> to vector<8x1xf32>
    %111 = vector.broadcast %110 : vector<8x1xf32> to vector<8x8xf32>
    %112 = arith.subf %108, %111 : vector<8x8xf32>
    %113 = math.exp %112 : vector<8x8xf32>
    %cst_39 = arith.constant dense<0.000000e+00> : vector<8xf32>
    %114 = vector.multi_reduction <add>, %113, %cst_39 [1] : vector<8x8xf32> to vector<8xf32>
    %115 = vector.shape_cast %114 : vector<8xf32> to vector<8x1xf32>
    %116 = vector.broadcast %115 : vector<8x1xf32> to vector<8x8xf32>
    %117 = arith.divf %113, %116 : vector<8x8xf32>
    %cst_40 = arith.constant dense<0.000000e+00> : vector<8x4xf32>
    %118 = tpu.matmul %117, %105, %cst_40 {dimension_numbers = #tpu.dot_dimension_numbers<[1], [0], [0], [1], [0, 0, 1, 1], [], []>, precision = #tpu.contract_precision<fp32>} : vector<8x8xf32>, vector<8x4xf32>, vector<8x4xf32> -> vector<8x4xf32>
    %119 = vector.extract_strided_slice %6 {offsets = [0, 28], sizes = [8, 4], strides = [1, 1]} : vector<8x96xf32> to vector<8x4xf32>
    %120 = vector.extract_strided_slice %6 {offsets = [0, 60], sizes = [8, 4], strides = [1, 1]} : vector<8x96xf32> to vector<8x4xf32>
    %121 = vector.extract_strided_slice %6 {offsets = [0, 92], sizes = [8, 4], strides = [1, 1]} : vector<8x96xf32> to vector<8x4xf32>
    %cst_41 = arith.constant dense<0.000000e+00> : vector<8x8xf32>
    %122 = tpu.matmul %119, %120, %cst_41 {dimension_numbers = #tpu.dot_dimension_numbers<[1], [1], [0], [0], [0, 0, 1, 0], [], []>, precision = #tpu.contract_precision<fp32>} : vector<8x4xf32>, vector<8x4xf32>, vector<8x8xf32> -> vector<8x8xf32>
    %cst_42 = arith.constant 5.000000e-01 : f32
    %123 = vector.broadcast %cst_42 : f32 to vector<8x8xf32>
    %124 = arith.mulf %122, %123 : vector<8x8xf32>
    %cst_43 = arith.constant dense<0xFF800000> : vector<8xf32>
    %125 = vector.multi_reduction <maximumf>, %124, %cst_43 [1] : vector<8x8xf32> to vector<8xf32>
    %126 = vector.shape_cast %125 : vector<8xf32> to vector<8x1xf32>
    %127 = vector.broadcast %126 : vector<8x1xf32> to vector<8x8xf32>
    %128 = arith.subf %124, %127 : vector<8x8xf32>
    %129 = math.exp %128 : vector<8x8xf32>
    %cst_44 = arith.constant dense<0.000000e+00> : vector<8xf32>
    %130 = vector.multi_reduction <add>, %129, %cst_44 [1] : vector<8x8xf32> to vector<8xf32>
    %131 = vector.shape_cast %130 : vector<8xf32> to vector<8x1xf32>
    %132 = vector.broadcast %131 : vector<8x1xf32> to vector<8x8xf32>
    %133 = arith.divf %129, %132 : vector<8x8xf32>
    %cst_45 = arith.constant dense<0.000000e+00> : vector<8x4xf32>
    %134 = tpu.matmul %133, %121, %cst_45 {dimension_numbers = #tpu.dot_dimension_numbers<[1], [0], [0], [1], [0, 0, 1, 1], [], []>, precision = #tpu.contract_precision<fp32>} : vector<8x8xf32>, vector<8x4xf32>, vector<8x4xf32> -> vector<8x4xf32>
    %135 = tpu.concatenate %22, %38, %54, %70, %86, %102, %118, %134 in 1 : vector<8x4xf32>, vector<8x4xf32>, vector<8x4xf32>, vector<8x4xf32>, vector<8x4xf32>, vector<8x4xf32>, vector<8x4xf32>, vector<8x4xf32> -> vector<8x32xf32>
    %c0_46 = arith.constant 0 : index
    %c0_47 = arith.constant 0 : index
    %136 = vector.load %arg4[%c0_46, %c0_47] : memref<32x32xf32, #tpu.memory_space<vmem>>, vector<32x32xf32>
    %cst_48 = arith.constant dense<0.000000e+00> : vector<8x32xf32>
    %137 = tpu.matmul %135, %136, %cst_48 {dimension_numbers = #tpu.dot_dimension_numbers<[1], [0], [0], [1], [0, 0, 1, 1], [], []>, precision = #tpu.contract_precision<fp32>} : vector<8x32xf32>, vector<32x32xf32>, vector<8x32xf32> -> vector<8x32xf32>
    %c0_49 = arith.constant 0 : index
    %c0_50 = arith.constant 0 : index
    %138 = vector.load %arg5[%c0_49, %c0_50] : memref<1x32xf32, #tpu.memory_space<vmem>>, vector<1x32xf32>
    %139 = vector.broadcast %138 : vector<1x32xf32> to vector<8x32xf32>
    %140 = arith.addf %137, %139 : vector<8x32xf32>
    %c0_51 = arith.constant 0 : index
    %c0_52 = arith.constant 0 : index
    %c0_53 = arith.constant 0 : index
    %141 = vector.load %arg6[%c0_51, %c0_52, %c0_53] : memref<1x8x32xf32, #tpu.memory_space<vmem>>, vector<1x8x32xf32>
    %142 = vector.shape_cast %141 : vector<1x8x32xf32> to vector<8x32xf32>
    %143 = vector.shape_cast %140 : vector<8x32xf32> to vector<1x8x32xf32>
    tpu.vector_store %arg6[%c0_51, %c0_52, %c0_53], %143 {strides = array<i32>} : memref<1x8x32xf32, #tpu.memory_space<vmem>>, vector<1x8x32xf32>,
    return
  }
  func.func @transform_0(%arg0: i32) -> (i32, i32, i32) {
    %c0_i32 = arith.constant 0 : i32
    %c0_i32_0 = arith.constant 0 : i32
    %c0_i32_1 = arith.constant 0 : i32
    return %arg0, %c0_i32, %c0_i32_0 : i32, i32, i32
  }
  func.func @transform_1(%arg0: i32) -> (i32, i32) {
    %c0_i32 = arith.constant 0 : i32
    %c0_i32_0 = arith.constant 0 : i32
    %c0_i32_1 = arith.constant 0 : i32
    return %c0_i32, %c0_i32_0 : i32, i32
  }
  func.func @transform_2(%arg0: i32) -> (i32, i32) {
    %c0_i32 = arith.constant 0 : i32
    %c0_i32_0 = arith.constant 0 : i32
    %c0_i32_1 = arith.constant 0 : i32
    return %c0_i32, %c0_i32_0 : i32, i32
  }
  func.func @transform_3(%arg0: i32) -> (i32, i32) {
    %c0_i32 = arith.constant 0 : i32
    %c0_i32_0 = arith.constant 0 : i32
    %c0_i32_1 = arith.constant 0 : i32
    return %c0_i32, %c0_i32_0 : i32, i32
  }
  func.func @transform_4(%arg0: i32) -> (i32, i32) {
    %c0_i32 = arith.constant 0 : i32
    %c0_i32_0 = arith.constant 0 : i32
    %c0_i32_1 = arith.constant 0 : i32
    return %c0_i32, %c0_i32_0 : i32, i32
  }
  func.func @transform_5(%arg0: i32) -> (i32, i32, i32) {
    %c0_i32 = arith.constant 0 : i32
    %c0_i32_0 = arith.constant 0 : i32
    %c0_i32_1 = arith.constant 0 : i32
    return %arg0, %c0_i32, %c0_i32_0 : i32, i32, i32
  }
}

</mosaic_0001>

<bundles_post_ra>
// kernel: tpu_custom_call.1
= control target key start
LH: loop header
LB: loop body
LE: loop exit
PB: predicated region body
PF: predicated region fallthrough
CT: control target
= control target key end

     0   :  { %10 = vsyncpa [#allocation3], 0  ;;  %s10720_s0 = inlined_call_operand.hbm [shape: f32[2,8,32], index: 0, kind: input, shape index: {}]   ;;  %s10721_s1 = inlined_call_operand.hbm [shape: f32[32,96], index: 1, kind: input, shape index: {}]   ;;  %s10722_s2 = inlined_call_operand.vmem [shape: f32[1,96], index: 2, kind: input, shape index: {}]   ;;  %s10723_s3 = inlined_call_operand.hbm [shape: f32[32,32], index: 3, kind: input, shape index: {}]   ;;  %s10724_s4 = inlined_call_operand.vmem [shape: f32[1,32], index: 4, kind: input, shape index: {}]   ;;  %s10725_s5 = inlined_call_operand.hbm [shape: f32[2,8,32], index: 5, kind: output, shape index: {}]  }
   0x1   :  { %12 = vsyncpa [#allocation3 + $0x1], 0 }
   0x2   :  { %13 = vsyncpa [#allocation6], 0 }
   0x3   :  { %14 = vsyncpa [#allocation4], 0 }
   0x4   :  { %16 = vsyncpa [#allocation4 + $0x1], 0  ;;  %s9991_s18 = smov 0   ;;  %s9993_s19 = smov 0  }
   0x5   :  { %s9995_s20 = smov 0   ;;  %s9997_s21 = smov 0  }
   0x6 LB: > { %s10012_s22 = sadd.s32 4294967295, %s9921_s21   ;;  %s8758_s23 = sadd.s32 4294967294, %s9921_s21   ;;  %s9921_s21 = sphi %s9997_s21, %s10747_s21   ;;  %s9917_s20 = sphi %s9995_s20, %s10746_s20   ;;  %s9913_s19 = sphi %s9993_s19, %s10745_s19   ;;  %s9909_s18 = sphi %s9991_s18, %s10744_s18  }
   0x7   : > { %p42_p0 = scmp.ne.s32.totalorder %s9913_s19, %s9909_s18  ;;  %p10726_p1 = scmp.eq.s32.totalorder %s10012_s22, 0 }
   0x8   : > { %p156_p3 = scmp.eq.s32.totalorder %s8758_s23, 1  ;;  %p8759_p5 = scmp.ge.s32.totalorder %s9921_s21, 1 }
   0x9   : > { %p10021_p4 = por %p10726_p1, %p42_p0  ;;  %p163_p7 = scmp.lt.s32.totalorder %s9921_s21, 3 }
   0xa   : > { %p10026_p6 = por %p156_p3, %p42_p0  ;;  %s9923_s27 = smov [#allocation5]  }
   0xb   : > { %s10730_s24 = scalar_select %p10021_p4, 1, 0 }
   0xc   : > { %s10731_s25 = scalar_select %p10026_p6, 1, 0 }
   0xd   : > { %p10031_p8 = pnand %p8759_p5, %p163_p7  ;;  %s175_s28 = sshll.u32 %s9923_s27, 4  ;;  %s176_s28 = int_to_ptr.vmem [resolvable:$true] %s175_s28 }
   0xe   : > { %s9924_s30 = smov [#allocation7]   ;;  %s9784_s7 = scalar_lea.vmem %s176_s28, 512 }
   0xf   : > { %s10732_s26 = scalar_select %p10031_p8, 1, 0 }
  0x10   : > { %p9652_p9 = pneg %p10031_p8  ;;  %s191_s6 = sshll.u32 %s9924_s30, 4  ;;  %s192_s6 = int_to_ptr.vmem [resolvable:$true] %s191_s6 }
  0x11   : > { %p9785_p13 = scmp.ne.s32.totalorder %s176_s28, %s9784_s7  ;;  %p9792_p5 = scmp.lt.s32.totalorder %s176_s28, %s176_s28 }
  0x12   : > { %p10040_p11 = pnand %p9652_p9, %p10726_p1  ;;  %p9793_p7 = scmp.lt.s32.totalorder %s9784_s7, %s9784_s7 }
  0x14   : > { %p9775_p12 = pneg %p10040_p11  ;;  %p9794_p10 = por %p9793_p7, %p9792_p5 }
  0x16   : > { %p9787_p0 = pnand %p9785_p13, %p9775_p12 }
  0x18   : > { %p9788_p3 = pneg %p9787_p0 }
  0x1a   : > { %p9795_p9 = pnand %p9794_p10, %p9788_p3 }
  0x1c   : > { %9798 = shalt.err (!%p9795_p9)
}
  0x1d   : > { %s9925_s8 = smov 128   ;;  %s9926_s9 = smov 8  }
  0x1e   : > { %9655 = dma.hbm_to_vmem [thread:$0]  (!%p10040_p11), %s10721_s1, 512, %s176_s28, [#allocation6], %s9925_s8, %s9925_s8, %s9926_s9  }
  0x1f   : > { %s9810_s12 = scalar_lea.vmem %s192_s6, 512  ;;  %p9818_p2 = scmp.lt.s32.totalorder %s192_s6, %s192_s6 }
  0x20   : > { %p9811_p1 = scmp.ne.s32.totalorder %s192_s6, %s9810_s12  ;;  %p9819_p6 = scmp.lt.s32.totalorder %s9810_s12, %s9810_s12 }
  0x22   : > { %p9813_p13 = pnand %p9811_p1, %p9775_p12  ;;  %p9820_p5 = por %p9819_p6, %p9818_p2 }
  0x24   : > { %p9814_p0 = pneg %p9813_p13 }
  0x26   : > { %p9821_p10 = pnand %p9820_p5, %p9814_p0 }
  0x28   : > { %9824 = shalt.err (!%p9821_p10)
}
  0x29   : > { %9658 = dma.hbm_to_vmem [thread:$0]  (!%p10040_p11), %s10723_s3, 512, %s192_s6, [#allocation6], %s9925_s8, %s9925_s8, %s9926_s9  }
  0x2a   : > { %s10063_s15 = sadd.s32 1, %s9921_s21   ;;  %s29_s16 = sadd.s32 1, %s9917_s20 }
  0x2b   : > { %s26_s17 = ssub.s32 %s9921_s21, %s10063_s15  ;;  %p36_p1 = scmp.ne.s32.totalorder %s9917_s20, %s9913_s19 }
  0x2c   : > { %p27_p2 = scmp.eq.s32.totalorder %s26_s17, 0  ;;  %p37_p6 = scmp.eq.s32.totalorder %s9921_s21, 0 }
  0x2d   : > { %p10734_p12 = scmp.eq.s32.totalorder %s10012_s22, 1  ;;  %p9669_p7 = scmp.lt.s32.totalorder %s9921_s21, 2 }
  0x2e   : > { %s10079_s27 = scalar_select %p27_p2, %s9917_s20, %s29_s16  }
  0x2f   : > { %p10073_p3 = por %p10734_p12, %p36_p1  ;;  %p38_p9 = por %p37_p6, %p36_p1 }
  0x30   : > { %s208_s28 = sand.u32 1, %s9917_s20   ;;  %s8764_s30 = sshll.u32 %s9921_s21, 7 }
  0x31   : > { %s10735_s23 = scalar_select %p10073_p3, 1, 0 }
  0x32   : > { %s8763_s29 = sshll.u32 %s208_s28, 3  ;;  %s10086_s8 = scalar_lea.hbm %s10720_s0, %s8764_s30 }
  0x33   : > { %s212_s9 = scalar_lea.vmem [#allocation2], %s8763_s29  ;;  %p10088_p11 = pnand %p9669_p7, %p38_p9 }
  0x34   : > { %s219_s10 = sshll.u32 %s212_s9, 4  ;;  %s209_s12 = scalar_lea.sflag [#allocation3], %s208_s28  ;;  %s220_s10 = int_to_ptr.vmem [resolvable:$true] %s219_s10 }
  0x35   : > { %s9825_s13 = scalar_lea.hbm %s10086_s8, 128  ;;  %p9827_p0 = pneg %p10088_p11 }
  0x36   : > { %p9826_p13 = scmp.ne.s32.totalorder %s10086_s8, %s9825_s13  ;;  %s9830_s17 = scalar_lea.hbm %s10720_s0, 256 }
  0x37   : > { %p9831_p1 = scmp.lt.s32.totalorder %s10086_s8, %s10720_s0  ;;  %p9832_p2 = scmp.lt.s32.totalorder %s9830_s17, %s9825_s13 }
  0x38   : > { %p9828_p5 = pnand %p9827_p0, %p9826_p13 }
  0x39   : > { %p9833_p6 = por %p9832_p2, %p9831_p1 }
  0x3a   : > { %p9829_p10 = pneg %p9828_p5 }
  0x3c   : > { %p9834_p12 = pnand %p9833_p6, %p9829_p10 }
  0x3e   : > { %9837 = shalt.err (!%p9834_p12)
}
  0x3f   : > { %s9838_s6 = scalar_lea.vmem %s220_s10, 128  ;;  %s9927_s28 = smov [#allocation2]  }
  0x40   : > { %p9839_p7 = scmp.ne.s32.totalorder %s220_s10, %s9838_s6  ;;  %s9843_s7 = sshll.u32 %s9927_s28, 4  ;;  %s9844_s7 = int_to_ptr.vmem [resolvable:$false] %s9843_s7 }
  0x41   : > { %s9845_s9 = scalar_lea.vmem %s9844_s7, 256  ;;  %p9846_p13 = scmp.lt.s32.totalorder %s220_s10, %s9844_s7 }
  0x42   : > { %p9841_p9 = pnand %p9839_p7, %p9827_p0  ;;  %p9847_p5 = scmp.lt.s32.totalorder %s9845_s9, %s9838_s6 }
  0x44   : > { %p9842_p3 = pneg %p9841_p9  ;;  %p9848_p4 = por %p9847_p5, %p9846_p13 }
  0x46   : > { %p9849_p8 = pnand %p9848_p4, %p9842_p3 }
  0x48   : > { %9852 = shalt.err (!%p9849_p8)
}
  0x49   : > { %9662 = dma.hbm_to_vmem [thread:$0]  (!%p10088_p11), %s10086_s8, 128, %s220_s10, %s209_s12  }
  0x4a   : > { %p10737_p10 = scmp.ne.s32.totalorder %s10732_s26, 0 }
  0x4b   : > { %s10109_s13 = sand.u32 (!%p10737_p10), 1, %s9913_s19   ;;  %p10738_p4 = scmp.ne.s32.totalorder (!%p10737_p10), %s10730_s24, 0 }
  0x4c   : > { %228 = sbr.rel (%p10737_p10) target bundleno = 5329 (0x14d1), region = 40  ;;  %s8766_s14 = sshll.u32 (!%p10737_p10), %s10109_s13, 3 }
  0x4d   : > { %s231_s16 = scalar_lea.sflag (!%p10737_p10), [#allocation3], %s10109_s13  ;;  %s234_s17 = scalar_lea.vmem (!%p10737_p10), [#allocation2], %s8766_s14 }
  0x51   : > { %9896 = dma.done.wait (%p10738_p4), %s231_s16, 128  }
  0x52   : > { %9898 = vsyncadd (%p10738_p4), %s231_s16, 4294967168  ;;  %p10739_p8 = scmp.eq.s32.totalorder %s10012_s22, 0 }
  0x54   : > { %9900 = dma.done.wait (%p10739_p8), [#allocation6], 1024   ;;  %p10740_p3 = pmov %p10739_p8 }
  0x55   : > { %v9928_v0 = vmov 0.0   ;;  %vm9929_vm0 = vmmov 0   ;;  %vm281_vm1 = vcmask 261120   ;;  %v273_v1 = vld [vmem:[#allocation5 + $0x18] sm:$0xff]  ;;  %v272_v2 = vld [vmem:[#allocation5 + $0x10] sm:$0xff]  ;;  %v271_v3 = vld [vmem:[#allocation5 + $0x8] sm:$0xff] }
  0x56   : > { %9902 = vsyncadd (%p10740_p3), [#allocation6], 4294966272  ;;  %9028 = vmatprep.subr.mxu0 %v9928_v0  ;;  %9039 = vmatprep.subr.mxu1 %v9928_v0  ;;  %v10129_v4 = vand.u32 4294901760, %v273_v1  ;;  %v10131_v5 = vand.u32 4294901760, %v272_v2  ;;  %v10133_v6 = vand.u32 4294901760, %v271_v3  ;;  %v270_v7 = vld [vmem:[#allocation5] sm:$0xff] }
  0x57   : > { %9036 = vmatprep.mubr.msk.f32.mxu0 %vm9929_vm0, %v9928_v0  ;;  %9047 = vmatprep.mubr.msk.f32.mxu1 %vm9929_vm0, %v9928_v0  ;;  %v269_v8 = vld [vmem:[%s234_s17] sm:$0xff]  ;;  %v10135_v9 = vand.u32 4294901760, %v270_v7  ;;  %s9930_s8 = smov 64   ;;  %s9931_s10 = smov 96   ;;  %vm773_vm2 = vcmask 31744   ;;  %vm1225_vm3 = vcmask 64512  }
  0x58   : > { %v283_v10 = vsel %vm281_vm1, %v269_v8, 0  ;;  %9029 = vmatpush3.msra.mxu0 %v10129_v4  ;;  %v390_v11 = vsub.f32 %v273_v1, %v10129_v4  ;;  %v397_v13 = vsub.f32 %v272_v2, %v10131_v5  ;;  %v404_v14 = vsub.f32 %v271_v3, %v10133_v6  ;;  %v8770_v35 = vld [vmem:[%s10722_s2] ss:$0 sm:$0xff]  ;;  %s9932_s11 = smov 92   ;;  %s9933_s12 = smov 124  }
  0x59   : > { %v10140_v12 = vand.u32 4294901760, %v283_v10  ;;  %9030 = vmatprep.subr.mxu0 %v9928_v0  ;;  %v411_v15 = vsub.f32 %v270_v7, %v10135_v9  ;;  %s9934_s30 = smov 60   ;;  %s9935_s29 = smov 88   ;;  %vm8145_vm4 = vcmask 97280   ;;  %vm8147_vm5 = vcmask 130048  }
  0x5a   : > { %9031 = vmatpush3.msra.mxu0 %v10131_v5  ;;  %v391_v16 = vand.u32 4294901760, %v390_v11  ;;  %v398_v18 = vand.u32 4294901760, %v397_v13  ;;  %v405_v19 = vand.u32 4294901760, %v404_v14  ;;  %s9936_s6 = smov 120   ;;  %s9937_s28 = smov 56   ;;  %vm8149_vm6 = vcmask 162816  }
  0x5b   : > { %v355_v17 = vsub.f32 %v283_v10, %v10140_v12  ;;  %9032 = vmatprep.subr.mxu0 %v9928_v0  ;;  %v412_v20 = vand.u32 4294901760, %v411_v15  ;;  %s9938_s7 = smov 84   ;;  %s9939_s9 = smov 116   ;;  %vm8151_vm7 = vcmask 195584   ;;  %vm8153_vm8 = vcmask 228352  }
  0x5c   : > { %9033 = vmatpush3.msra.mxu0 %v10133_v6  ;;  %v392_v21 = vsub.f32 %v390_v11, %v391_v16  ;;  %v399_v23 = vsub.f32 %v397_v13, %v398_v18  ;;  %v406_v24 = vsub.f32 %v404_v14, %v405_v19  ;;  %s9940_s16 = smov 52   ;;  %s9941_s17 = smov 80  }
  0x5d   : > { %v356_v22 = vand.u32 4294901760, %v355_v17  ;;  %9034 = vmatprep.subr.mxu0 %v9928_v0  ;;  %v413_v28 = vsub.f32 %v411_v15, %v412_v20  ;;  %s9942_s24 = smov 112   ;;  %s9943_s26 = smov 48  }
  0x5e   : > { %9035 = vmatpush3.msra.mxu0 %v10135_v9  ;;  %v393_v25 = vand.u32 4294901760, %v392_v21  ;;  %v400_v27 = vand.u32 4294901760, %v399_v23  ;;  %v407_v30 = vand.u32 4294901760, %v406_v24  ;;  %p10741_p0 = scmp.ne.s32.totalorder %s10735_s23, 0 }
  0x5f   : > { %v357_v26 = vsub.f32 %v355_v17, %v356_v22  ;;  %9050 = vmatprep.subr.mxu0 %v9928_v0  ;;  %v414_v31 = vand.u32 4294901760, %v413_v28 }
  0x60   : > { %9040 = vmatpush3.msra.mxu1 %v393_v25 }
  0x61   : > { %v358_v29 = vand.u32 4294901760, %v357_v26  ;;  %9041 = vmatprep.subr.mxu1 %v9928_v0 }
  0x62   : > { %9042 = vmatpush3.msra.mxu1 %v400_v27 }
  0x63   : > { %9037 = vmatmul.mubr.f32.vlgmr.msra.gmra.mxu0 %v358_v29  ;;  %9043 = vmatprep.subr.mxu1 %v9928_v0 }
  0x64   : > { %9051 = vmatpush3.msra.mxu0 %v390_v11  ;;  %9044 = vmatpush3.msra.mxu1 %v407_v30 }
  0x65   : > { %9052 = vmatprep.subr.mxu0 %v9928_v0  ;;  %9045 = vmatprep.subr.mxu1 %v9928_v0 }
  0x66   : > { %9053 = vmatpush3.msra.mxu0 %v397_v13  ;;  %9046 = vmatpush3.msra.mxu1 %v414_v31 }
  0x67   : > { %9054 = vmatprep.subr.mxu0 %v9928_v0  ;;  %9048 = vmatmul.mubr.f32.vlgmr.msra.gmra.mxu1 %v10140_v12 }
  0x68   : > { %9055 = vmatpush3.msra.mxu0 %v404_v14  ;;  %9061 = vmatprep.subr.mxu1 %v9928_v0 }
  0x69   : > { %9056 = vmatprep.subr.mxu0 %v9928_v0  ;;  %9062 = vmatpush3.msra.mxu1 %v10129_v4 }
  0x6a   : > { %9057 = vmatpush3.msra.mxu0 %v411_v15  ;;  %9058 = vmatprep.mubr.msk.f32.mxu0 %vm9929_vm0, %v9928_v0 }
  0x6b   : > { %9063 = vmatprep.subr.mxu1 %v9928_v0  ;;  %9072 = vmatprep.subr.mxu0 %v9928_v0 }
  0x6c   : > { %9059 = vmatmul.mubr.f32.vlgmr.msra.gmra.mxu0 %v355_v17  ;;  %9064 = vmatpush3.msra.mxu1 %v10131_v5 }
  0x6d   : > { %9073 = vmatpush3.msra.mxu0 %v391_v16  ;;  %9065 = vmatprep.subr.mxu1 %v9928_v0 }
  0x6e   : > { %9074 = vmatprep.subr.mxu0 %v9928_v0  ;;  %9066 = vmatpush3.msra.mxu1 %v10133_v6 }
  0x6f   : > { %9075 = vmatpush3.msra.mxu0 %v398_v18  ;;  %9067 = vmatprep.subr.mxu1 %v9928_v0 }
  0x70   : > { %9076 = vmatprep.subr.mxu0 %v9928_v0  ;;  %9068 = vmatpush3.msra.mxu1 %v10135_v9 }
  0x71   : > { %9069 = vmatprep.mubr.msk.f32.mxu1 %vm9929_vm0, %v9928_v0  ;;  %9077 = vmatpush3.msra.mxu0 %v405_v19 }
  0x72   : > { %9070 = vmatmul.mubr.f32.vlgmr.msra.gmra.mxu1 %v356_v22  ;;  %9078 = vmatprep.subr.mxu0 %v9928_v0 }
  0x73   : > { %9083 = vmatprep.subr.mxu1 %v9928_v0  ;;  %9079 = vmatpush3.msra.mxu0 %v412_v20 }
  0x74   : > { %9080 = vmatprep.mubr.msk.f32.mxu0 %vm9929_vm0, %v9928_v0  ;;  %9084 = vmatpush3.msra.mxu1 %v10129_v4 }
  0x75   : > { %9081 = vmatmul.mubr.f32.vlgmr.msra.gmra.mxu0 %v10140_v12  ;;  %9085 = vmatprep.subr.mxu1 %v9928_v0 }
  0x76   : > { %9091 = vmatprep.mubr.msk.f32.mxu1 %vm9929_vm0, %v9928_v0  ;;  %9086 = vmatpush3.msra.mxu1 %v10131_v5 }
  0x77   : > { %9094 = vmatprep.subr.mxu0 %v9928_v0  ;;  %9087 = vmatprep.subr.mxu1 %v9928_v0 }
  0x78   : > { %9096 = vmatprep.mubr.msk.f32.mxu0 %vm9929_vm0, %v9928_v0  ;;  %9088 = vmatpush3.msra.mxu1 %v10133_v6 }
  0x79   : > { %9089 = vmatprep.subr.mxu1 %v9928_v0 }
  0x7a   : > { %9090 = vmatpush3.msra.mxu1 %v10135_v9 }
  0x7b   : > { %9092 = vmatmul.mubr.f32.vlgmr.msra.gmra.mxu1 %v10140_v12  ;;  %9099 = vmatprep.subr.mxu1 %v9928_v0 }
  0x7c   : > { %9101 = vmatprep.mubr.msk.f32.mxu1 %vm9929_vm0, %v9928_v0 }
 0x123   : > { %v360_v32 = vpop.f32.mrf.mxu0 }
 0x124   : > { %v361_v38 = vadd.f32 %v8770_v35, %v360_v32 }
 0x125   : > { %v9038_v33 = vpop.f32.mrf.mxu0 }
 0x127   : > { %v451_v34 = vpop.f32.mrf.mxu1 }
 0x128   : > { %v452_v40 = vadd.f32 %v451_v34, %v361_v38 }
 0x129   : > { %v9049_v36 = vpop.f32.mrf.mxu1 }
 0x12c   : > { %v531_v37 = vpop.f32.mrf.mxu0 }
 0x12d   : > { %v532_v43 = vadd.f32 %v531_v37, %v452_v40 }
 0x12e   : > { %v9060_v39 = vpop.f32.mrf.mxu0 }
 0x132   : > { %v608_v41 = vpop.f32.mrf.mxu1 }
 0x133   : > { %v609_v45 = vadd.f32 %v608_v41, %v532_v43 }
 0x134   : > { %v9071_v42 = vpop.f32.mrf.mxu1 }
 0x135   : > { %v691_v44 = vpop.f32.mrf.mxu0 }
 0x136   : > { %v692_v47 = vadd.f32 %v691_v44, %v609_v45 }
 0x137   : > { %v9082_v46 = vpop.f32.mrf.mxu0 }
 0x13b   : > { %v766_v48 = vpop.f32.mrf.mxu1 }
 0x13c   : > { %v10199_v49 = vadd.f32 %v766_v48, %v692_v47 }
 0x13d   : > { %v9093_v50 = vpop.f32.mrf.mxu1 }
 0x13e   : > { %1237 = vrot.lane.b32.xlu1 %v10199_v49, %s9930_s8  ;;  %771 = vrot.lane.b32.xlu0 %v10199_v49, %s9931_s10  ;;  %v774_v51 = vsel %vm773_vm2, %v10199_v49, 0  ;;  %s9944_s8 = smov 76   ;;  %s9945_s10 = smov 108  }
 0x13f   : > { %v844_v52 = vand.u32 4294901760, %v774_v51 }
 0x141   : > { %v845_v53 = vsub.f32 %v774_v51, %v844_v52 }
 0x143   : > { %v846_v54 = vand.u32 4294901760, %v845_v53 }
 0x145   : > { %v847_v57 = vsub.f32 %v845_v53, %v846_v54 }
 0x147   : > { %v848_v61 = vand.u32 4294901760, %v847_v57 }
 0x1b0   : > { %v772_v55 = vpop.permute.xlu0 %771  ;;  %v1238_v59 = vpop.permute.xlu1 %1237 }
 0x1b1   : > { %v776_v56 = vsel %vm773_vm2, %v772_v55, 0  ;;  %v10207_v62 = vand.u32 4294901760, %v1238_v59 }
 0x1b2   : > { %v809_v58 = vand.u32 4294901760, %v776_v56 }
 0x1b3   : > { %v10213_v2 = vsub.f32 %v1238_v59, %v10207_v62 }
 0x1b4   : > { %v886_v60 = vsub.f32 %v776_v56, %v809_v58  ;;  %9095 = vmatpush3.xpose.msra.mxu0 %v809_v58 }
 0x1b5   : > { %9104 = vmatprep.subr.mxu0 %v9928_v0  ;;  %v1352_v4 = vand.u32 4294901760, %v10213_v2 }
 0x1b6   : > { %v887_v63 = vand.u32 4294901760, %v886_v60 }
 0x1b7   : > { %9097 = vmatmul.mubr.f32.vlgmr.msra.gmra.mxu0 %v848_v61  ;;  %v1353_v5 = vsub.f32 %v10213_v2, %v1352_v4 }
 0x1b8   : > { %v888_v1 = vsub.f32 %v886_v60, %v887_v63  ;;  %9105 = vmatpush3.xpose.msra.mxu0 %v886_v60  ;;  %9106 = vmatprep.mubr.msk.f32.mxu0 %vm9929_vm0, %v9928_v0 }
 0x1b9   : > { %9114 = vmatprep.subr.mxu0 %v9928_v0  ;;  %v1354_v6 = vand.u32 4294901760, %v1353_v5 }
 0x1ba   : > { %v889_v3 = vand.u32 4294901760, %v888_v1 }
 0x1bb   : > { %9107 = vmatmul.mubr.f32.vlgmr.msra.gmra.mxu0 %v845_v53 }
 0x1bc   : > { %9100 = vmatpush3.xpose.msra.mxu1 %v889_v3  ;;  %9115 = vmatpush3.xpose.msra.mxu0 %v887_v63 }
 0x1bd   : > { %9116 = vmatprep.mubr.msk.f32.mxu0 %vm9929_vm0, %v9928_v0  ;;  %9109 = vmatprep.subr.mxu1 %v9928_v0 }
 0x1be   : > { %9124 = vmatprep.subr.mxu0 %v9928_v0 }
 0x1bf   : > { %9102 = vmatmul.mubr.f32.vlgmr.msra.gmra.mxu1 %v844_v52  ;;  %9117 = vmatmul.mubr.f32.vlgmr.msra.gmra.mxu0 %v844_v52 }
 0x1c0   : > { %9110 = vmatpush3.xpose.msra.mxu1 %v809_v58  ;;  %9125 = vmatpush3.msra.mxu0 %v10207_v62 }
 0x1c1   : > { %9111 = vmatprep.mubr.msk.f32.mxu1 %vm9929_vm0, %v9928_v0  ;;  %9119 = vmatprep.subr.mxu1 %v9928_v0 }
 0x1c2   : > { %9126 = vmatprep.mubr.msk.f32.mxu0 %vm9929_vm0, %v9928_v0  ;;  %9134 = vmatprep.subr.mxu0 %v9928_v0 }
 0x1c3   : > { %9112 = vmatmul.mubr.f32.vlgmr.msra.gmra.mxu1 %v846_v54 }
 0x1c4   : > { %9120 = vmatpush3.xpose.msra.mxu1 %v809_v58  ;;  %9121 = vmatprep.mubr.msk.f32.mxu1 %vm9929_vm0, %v9928_v0 }
 0x1c5   : > { %9129 = vmatprep.subr.mxu1 %v9928_v0 }
 0x1c7   : > { %9122 = vmatmul.mubr.f32.vlgmr.msra.gmra.mxu1 %v844_v52 }
 0x1c8   : > { %9130 = vmatpush3.msra.mxu1 %v1354_v6  ;;  %9131 = vmatprep.mubr.msk.f32.mxu1 %vm9929_vm0, %v9928_v0 }
 0x1c9   : > { %9139 = vmatprep.subr.mxu1 %v9928_v0 }
 0x277   : > { %v850_v7 = vpop.f32.mrf.mxu0 }
 0x279   : > { %v9098_v8 = vpop.f32.mrf.mxu0 }
 0x27b   : > { %v1000_v9 = vpop.f32.mrf.mxu0 }
 0x27d   : > { %v9108_v10 = vpop.f32.mrf.mxu0 }
 0x27f   : > { %v926_v11 = vpop.f32.mrf.mxu1  ;;  %v1148_v12 = vpop.f32.mrf.mxu0 }
 0x280   : > { %v927_v13 = vadd.f32 %v926_v11, %v850_v7 }
 0x281   : > { %v9103_v14 = vpop.f32.mrf.mxu1  ;;  %v9118_v15 = vpop.f32.mrf.mxu0 }
 0x282   : > { %v1001_v16 = vadd.f32 %v1000_v9, %v927_v13 }
 0x283   : > { %v1074_v17 = vpop.f32.mrf.mxu1 }
 0x284   : > { %v1075_v18 = vadd.f32 %v1074_v17, %v1001_v16 }
 0x285   : > { %v9113_v19 = vpop.f32.mrf.mxu1 }
 0x286   : > { %v1149_v20 = vadd.f32 %v1148_v12, %v1075_v18 }
 0x287   : > { %v1220_v21 = vpop.f32.mrf.mxu1 }
 0x288   : > { %v1221_v22 = vadd.f32 %v1220_v21, %v1149_v20 }
 0x289   : > { %v9123_v23 = vpop.f32.mrf.mxu1 }
 0x28a   : > { %v1224_v24 = vmul.f32 0.5, %v1221_v22 }
 0x28c   : > { %v1226_v25 = vsel %vm1225_vm3, %v1224_v24, -inf }
 0x28d   : > { %1227 = vmax.xlane.f32.xlu0 %v1226_v25 }
 0x316   : > { %v1228_v26 = vpop.xlane.xlu0 %1227 }
 0x317   : > { %v1229_v27 = vsub.f32 %v1224_v24, %v1228_v26 }
 0x319   : > { %v1230_v28 = vmul.f32 1.442695, %v1229_v27 }
 0x31b   : > { %9741 = vpow2.f32 %v1230_v28 }
 0x328   : > { %v9742_v29 = vpop.eup %9741 }
 0x329   : > { %v1232_v30 = vsel %vm1225_vm3, %v9742_v29, 0.0 }
 0x32a   : > { %1233 = vadd.xlane.f32.xlu1 %v1232_v30 }
 0x33b   : > { %1691 = vrot.lane.b32.xlu1 %v10199_v49, %s9932_s11  ;;  %s9946_s11 = smov 44  }
 0x33f   : > { %1689 = vrot.lane.b32.xlu1 %v10199_v49, %s9933_s12  ;;  %s9947_s12 = smov 72  }
 0x3b3   : > { %v1234_v31 = vpop.xlane.xlu1 %1233 }
 0x3b4   : > { %9743 = vrcp.f32 %v1234_v31 }
 0x3b7   : > { %v1692_v32 = vpop.permute.xlu1 %1691 }
 0x3b8   : > { %v1695_v33 = vsel %vm773_vm2, %v1692_v32, 0 }
 0x3b9   : > { %v1728_v34 = vand.u32 4294901760, %v1695_v33 }
 0x3bb   : > { %v1805_v36 = vsub.f32 %v1695_v33, %v1728_v34  ;;  %v1690_v38 = vpop.permute.xlu1 %1689 }
 0x3bc   : > { %v1693_v42 = vsel %vm773_vm2, %v1690_v38, 0 }
 0x3bd   : > { %v1806_v41 = vand.u32 4294901760, %v1805_v36  ;;  %v1763_v44 = vand.u32 4294901760, %v1693_v42 }
 0x3bf   : > { %v1807_v46 = vsub.f32 %v1805_v36, %v1806_v41  ;;  %v1764_v48 = vsub.f32 %v1693_v42, %v1763_v44 }
 0x3c1   : > { %v9744_v35 = vpop.eup %9743  ;;  %v1808_v51 = vand.u32 4294901760, %v1807_v46  ;;  %v1765_v52 = vand.u32 4294901760, %v1764_v48 }
 0x3c2   : > { %v1236_v37 = vmul.f32 %v9744_v35, %v9742_v29 }
 0x3c3   : > { %v1766_v53 = vsub.f32 %v1764_v48, %v1765_v52 }
 0x3c4   : > { %v1241_v39 = vsel %vm1225_vm3, %v1236_v37, 0 }
 0x3c5   : > { %v1309_v40 = vand.u32 4294901760, %v1241_v39  ;;  %v1767_v54 = vand.u32 4294901760, %v1766_v53 }
 0x3c7   : > { %v1310_v43 = vsub.f32 %v1241_v39, %v1309_v40  ;;  %9132 = vmatmul.mubr.f32.vlgmr.msra.gmra.mxu1 %v1309_v40 }
 0x3c8   : > { %9140 = vmatpush3.msra.mxu1 %v10207_v62  ;;  %9141 = vmatprep.mubr.msk.f32.mxu1 %vm9929_vm0, %v9928_v0 }
 0x3c9   : > { %9149 = vmatprep.subr.mxu1 %v9928_v0  ;;  %v1311_v45 = vand.u32 4294901760, %v1310_v43 }
 0x3cb   : > { %9142 = vmatmul.mubr.f32.vlgmr.msra.gmra.mxu1 %v1311_v45  ;;  %v1312_v47 = vsub.f32 %v1310_v43, %v1311_v45 }
 0x3cc   : > { %9150 = vmatpush3.msra.mxu1 %v10207_v62  ;;  %9151 = vmatprep.mubr.msk.f32.mxu1 %vm9929_vm0, %v9928_v0 }
 0x3cd   : > { %9159 = vmatprep.subr.mxu1 %v9928_v0  ;;  %v1313_v50 = vand.u32 4294901760, %v1312_v47 }
 0x3cf   : > { %9127 = vmatmul.mubr.f32.vlgmr.msra.gmra.mxu0 %v1313_v50  ;;  %9152 = vmatmul.mubr.f32.vlgmr.msra.gmra.mxu1 %v1309_v40 }
 0x3d0   : > { %9135 = vmatpush3.msra.mxu0 %v10213_v2  ;;  %9160 = vmatpush3.xpose.msra.mxu1 %v1808_v51 }
 0x3d1   : > { %9136 = vmatprep.mubr.msk.f32.mxu0 %vm9929_vm0, %v9928_v0  ;;  %9144 = vmatprep.subr.mxu0 %v9928_v0 }
 0x3d2   : > { %9161 = vmatprep.mubr.msk.f32.mxu1 %vm9929_vm0, %v9928_v0  ;;  %9169 = vmatprep.subr.mxu1 %v9928_v0 }
 0x3d3   : > { %9137 = vmatmul.mubr.f32.vlgmr.msra.gmra.mxu0 %v1310_v43  ;;  %9162 = vmatmul.mubr.f32.vlgmr.msra.gmra.mxu1 %v1763_v44 }
 0x3d4   : > { %9145 = vmatpush3.msra.mxu0 %v1352_v4  ;;  %9170 = vmatpush3.xpose.msra.mxu1 %v1728_v34 }
 0x3d5   : > { %9146 = vmatprep.mubr.msk.f32.mxu0 %vm9929_vm0, %v9928_v0  ;;  %9154 = vmatprep.subr.mxu0 %v9928_v0 }
 0x3d6   : > { %9171 = vmatprep.mubr.msk.f32.mxu1 %vm9929_vm0, %v9928_v0  ;;  %9179 = vmatprep.subr.mxu1 %v9928_v0 }
 0x3d7   : > { %9147 = vmatmul.mubr.f32.vlgmr.msra.gmra.mxu0 %v1309_v40  ;;  %9172 = vmatmul.mubr.f32.vlgmr.msra.gmra.mxu1 %v1765_v52 }
 0x3d8   : > { %9155 = vmatpush3.xpose.msra.mxu0 %v1728_v34  ;;  %9180 = vmatpush3.xpose.msra.mxu1 %v1728_v34 }
 0x3d9   : > { %9156 = vmatprep.mubr.msk.f32.mxu0 %vm9929_vm0, %v9928_v0  ;;  %9164 = vmatprep.subr.mxu0 %v9928_v0 }
 0x3da   : > { %9181 = vmatprep.mubr.msk.f32.mxu1 %vm9929_vm0, %v9928_v0  ;;  %9189 = vmatprep.subr.mxu1 %v9928_v0 }
 0x3db   : > { %9157 = vmatmul.mubr.f32.vlgmr.msra.gmra.mxu0 %v1767_v54  ;;  %9182 = vmatmul.mubr.f32.vlgmr.msra.gmra.mxu1 %v1763_v44 }
 0x3dc   : > { %9165 = vmatpush3.xpose.msra.mxu0 %v1805_v36  ;;  %9166 = vmatprep.mubr.msk.f32.mxu0 %vm9929_vm0, %v9928_v0 }
 0x3dd   : > { %9174 = vmatprep.subr.mxu0 %v9928_v0  ;;  %9191 = vmatprep.mubr.msk.f32.mxu1 %vm9929_vm0, %v9928_v0 }
 0x3df   : > { %9167 = vmatmul.mubr.f32.vlgmr.msra.gmra.mxu0 %v1764_v48 }
 0x3e0   : > { %9175 = vmatpush3.xpose.msra.mxu0 %v1806_v41  ;;  %9176 = vmatprep.mubr.msk.f32.mxu0 %vm9929_vm0, %v9928_v0 }
 0x3e1   : > { %9184 = vmatprep.subr.mxu0 %v9928_v0 }
 0x3e3   : > { %9177 = vmatmul.mubr.f32.vlgmr.msra.gmra.mxu0 %v1763_v44 }
 0x3e4   : > { %9186 = vmatprep.mubr.msk.f32.mxu0 %vm9929_vm0, %v9928_v0 }
 0x487   : > { %v1391_v55 = vpop.f32.mrf.mxu1 }
 0x489   : > { %v9133_v56 = vpop.f32.mrf.mxu1 }
 0x48b   : > { %v1539_v57 = vpop.f32.mrf.mxu1 }
 0x48d   : > { %v9143_v58 = vpop.f32.mrf.mxu1 }
 0x48f   : > { %v1315_v59 = vpop.f32.mrf.mxu0  ;;  %v1685_v60 = vpop.f32.mrf.mxu1 }
 0x490   : > { %v1392_v61 = vadd.f32 %v1391_v55, %v1315_v59 }
 0x491   : > { %v9128_v62 = vpop.f32.mrf.mxu0  ;;  %v9153_v63 = vpop.f32.mrf.mxu1 }
 0x493   : > { %v1465_v1 = vpop.f32.mrf.mxu0  ;;  %v1845_v2 = vpop.f32.mrf.mxu1 }
 0x494   : > { %v1466_v3 = vadd.f32 %v1465_v1, %v1392_v61 }
 0x495   : > { %v9138_v4 = vpop.f32.mrf.mxu0  ;;  %v9163_v5 = vpop.f32.mrf.mxu1 }
 0x496   : > { %v1540_v6 = vadd.f32 %v1539_v57, %v1466_v3 }
 0x497   : > { %v1613_v7 = vpop.f32.mrf.mxu0  ;;  %v1993_v8 = vpop.f32.mrf.mxu1 }
 0x498   : > { %v1614_v9 = vadd.f32 %v1613_v7, %v1540_v6 }
 0x499   : > { %v9148_v10 = vpop.f32.mrf.mxu0  ;;  %v9173_v11 = vpop.f32.mrf.mxu1 }
 0x49a   : > { %v10282_v12 = vadd.f32 %v1685_v60, %v1614_v9 }
 0x49b   : > { %v1769_v13 = vpop.f32.mrf.mxu0  ;;  %v2139_v14 = vpop.f32.mrf.mxu1 }
 0x49c   : > { %v1846_v17 = vadd.f32 %v1845_v2, %v1769_v13 }
 0x49d   : > { %v9158_v15 = vpop.f32.mrf.mxu0  ;;  %v9183_v16 = vpop.f32.mrf.mxu1 }
 0x49f   : > { %v1919_v18 = vpop.f32.mrf.mxu0 }
 0x4a0   : > { %v1920_v19 = vadd.f32 %v1919_v18, %v1846_v17 }
 0x4a1   : > { %v9168_v20 = vpop.f32.mrf.mxu0 }
 0x4a2   : > { %v1994_v21 = vadd.f32 %v1993_v8, %v1920_v19 }
 0x4a3   : > { %v2067_v22 = vpop.f32.mrf.mxu0 }
 0x4a4   : > { %v2068_v23 = vadd.f32 %v2067_v22, %v1994_v21 }
 0x4a5   : > { %v9178_v24 = vpop.f32.mrf.mxu0 }
 0x4a6   : > { %v2140_v25 = vadd.f32 %v2139_v14, %v2068_v23 }
 0x4a8   : > { %v2143_v26 = vmul.f32 0.5, %v2140_v25 }
 0x4aa   : > { %v2144_v27 = vsel %vm1225_vm3, %v2143_v26, -inf }
 0x4ab   : > { %2145 = vmax.xlane.f32.xlu1 %v2144_v27 }
 0x534   : > { %v2146_v28 = vpop.xlane.xlu1 %2145 }
 0x535   : > { %v2147_v29 = vsub.f32 %v2143_v26, %v2146_v28 }
 0x537   : > { %v2148_v30 = vmul.f32 1.442695, %v2147_v29 }
 0x539   : > { %9745 = vpow2.f32 %v2148_v30 }
 0x546   : > { %v9746_v31 = vpop.eup %9745 }
 0x547   : > { %v2150_v32 = vsel %vm1225_vm3, %v9746_v31, 0.0 }
 0x548   : > { %2151 = vadd.xlane.f32.xlu0 %v2150_v32 }
 0x55e   : > { %2155 = vrot.lane.b32.xlu0 %v10199_v49, %s9934_s30  ;;  %s9948_s30 = smov 104  }
 0x562   : > { %2609 = vrot.lane.b32.xlu0 %v10199_v49, %s9935_s29  ;;  %s9949_s29 = smov 40  }
 0x566   : > { %2607 = vrot.lane.b32.xlu0 %v10199_v49, %s9936_s6  ;;  %s9950_s6 = smov 68  }
 0x5d1   : > { %v2152_v33 = vpop.xlane.xlu0 %2151 }
 0x5d2   : > { %9747 = vrcp.f32 %v2152_v33 }
 0x5d5   : > { %v2156_v34 = vpop.permute.xlu0 %2155 }
 0x5d6   : > { %v2192_v35 = vand.u32 4294901760, %v2156_v34 }
 0x5d8   : > { %v2269_v36 = vsub.f32 %v2156_v34, %v2192_v35  ;;  %9185 = vmatpush3.msra.mxu0 %v2192_v35 }
 0x5d9   : > { %v2610_v37 = vpop.permute.xlu0 %2609  ;;  %9194 = vmatprep.subr.mxu0 %v9928_v0 }
 0x5da   : > { %v2270_v38 = vand.u32 4294901760, %v2269_v36  ;;  %v2613_v39 = vsel %vm773_vm2, %v2610_v37, 0 }
 0x5db   : > { %v2646_v41 = vand.u32 4294901760, %v2613_v39 }
 0x5dc   : > { %v2271_v40 = vsub.f32 %v2269_v36, %v2270_v38 }
 0x5dd   : > { %v2723_v44 = vsub.f32 %v2613_v39, %v2646_v41  ;;  %v2608_v46 = vpop.permute.xlu0 %2607 }
 0x5de   : > { %v2272_v42 = vand.u32 4294901760, %v2271_v40  ;;  %v2611_v51 = vsel %vm773_vm2, %v2608_v46, 0 }
 0x5df   : > { %v9748_v43 = vpop.eup %9747  ;;  %v2724_v50 = vand.u32 4294901760, %v2723_v44  ;;  %v2681_v53 = vand.u32 4294901760, %v2611_v51 }
 0x5e0   : > { %9190 = vmatpush3.msra.mxu1 %v2272_v42  ;;  %v2154_v45 = vmul.f32 %v9748_v43, %v9746_v31 }
 0x5e1   : > { %9199 = vmatprep.subr.mxu1 %v9928_v0  ;;  %v2725_v55 = vsub.f32 %v2723_v44, %v2724_v50  ;;  %v2682_v57 = vsub.f32 %v2611_v51, %v2681_v53 }
 0x5e2   : > { %v2159_v47 = vsel %vm1225_vm3, %v2154_v45, 0 }
 0x5e3   : > { %v2227_v48 = vand.u32 4294901760, %v2159_v47  ;;  %v2726_v59 = vand.u32 4294901760, %v2725_v55  ;;  %v2683_v60 = vand.u32 4294901760, %v2682_v57 }
 0x5e5   : > { %v2228_v52 = vsub.f32 %v2159_v47, %v2227_v48  ;;  %9192 = vmatmul.mubr.f32.vlgmr.msra.gmra.mxu1 %v2227_v48  ;;  %v2684_v61 = vsub.f32 %v2682_v57, %v2683_v60 }
 0x5e6   : > { %9200 = vmatpush3.msra.mxu1 %v2192_v35  ;;  %9201 = vmatprep.mubr.msk.f32.mxu1 %vm9929_vm0, %v9928_v0 }
 0x5e7   : > { %9209 = vmatprep.subr.mxu1 %v9928_v0  ;;  %v2229_v54 = vand.u32 4294901760, %v2228_v52  ;;  %v2685_v62 = vand.u32 4294901760, %v2684_v61 }
 0x5e9   : > { %9202 = vmatmul.mubr.f32.vlgmr.msra.gmra.mxu1 %v2229_v54  ;;  %v2230_v56 = vsub.f32 %v2228_v52, %v2229_v54 }
 0x5ea   : > { %9210 = vmatpush3.msra.mxu1 %v2192_v35  ;;  %9211 = vmatprep.mubr.msk.f32.mxu1 %vm9929_vm0, %v9928_v0 }
 0x5eb   : > { %9219 = vmatprep.subr.mxu1 %v9928_v0  ;;  %v2231_v58 = vand.u32 4294901760, %v2230_v56 }
 0x5ed   : > { %9187 = vmatmul.mubr.f32.vlgmr.msra.gmra.mxu0 %v2231_v58  ;;  %9212 = vmatmul.mubr.f32.vlgmr.msra.gmra.mxu1 %v2227_v48 }
 0x5ee   : > { %9195 = vmatpush3.msra.mxu0 %v2269_v36  ;;  %9220 = vmatpush3.xpose.msra.mxu1 %v2726_v59 }
 0x5ef   : > { %9196 = vmatprep.mubr.msk.f32.mxu0 %vm9929_vm0, %v9928_v0  ;;  %9204 = vmatprep.subr.mxu0 %v9928_v0 }
 0x5f0   : > { %9221 = vmatprep.mubr.msk.f32.mxu1 %vm9929_vm0, %v9928_v0  ;;  %9229 = vmatprep.subr.mxu1 %v9928_v0 }
 0x5f1   : > { %9197 = vmatmul.mubr.f32.vlgmr.msra.gmra.mxu0 %v2228_v52  ;;  %9222 = vmatmul.mubr.f32.vlgmr.msra.gmra.mxu1 %v2681_v53 }
 0x5f2   : > { %9205 = vmatpush3.msra.mxu0 %v2270_v38  ;;  %9230 = vmatpush3.xpose.msra.mxu1 %v2646_v41 }
 0x5f3   : > { %9206 = vmatprep.mubr.msk.f32.mxu0 %vm9929_vm0, %v9928_v0  ;;  %9214 = vmatprep.subr.mxu0 %v9928_v0 }
 0x5f4   : > { %9231 = vmatprep.mubr.msk.f32.mxu1 %vm9929_vm0, %v9928_v0  ;;  %9239 = vmatprep.subr.mxu1 %v9928_v0 }
 0x5f5   : > { %9207 = vmatmul.mubr.f32.vlgmr.msra.gmra.mxu0 %v2227_v48  ;;  %9232 = vmatmul.mubr.f32.vlgmr.msra.gmra.mxu1 %v2683_v60 }
 0x5f6   : > { %9215 = vmatpush3.xpose.msra.mxu0 %v2646_v41  ;;  %9240 = vmatpush3.xpose.msra.mxu1 %v2646_v41 }
 0x5f7   : > { %9216 = vmatprep.mubr.msk.f32.mxu0 %vm9929_vm0, %v9928_v0  ;;  %9224 = vmatprep.subr.mxu0 %v9928_v0 }
 0x5f8   : > { %9241 = vmatprep.mubr.msk.f32.mxu1 %vm9929_vm0, %v9928_v0  ;;  %9249 = vmatprep.subr.mxu1 %v9928_v0 }
 0x5f9   : > { %9217 = vmatmul.mubr.f32.vlgmr.msra.gmra.mxu0 %v2685_v62  ;;  %9242 = vmatmul.mubr.f32.vlgmr.msra.gmra.mxu1 %v2681_v53 }
 0x5fa   : > { %9225 = vmatpush3.xpose.msra.mxu0 %v2723_v44  ;;  %9226 = vmatprep.mubr.msk.f32.mxu0 %vm9929_vm0, %v9928_v0 }
 0x5fb   : > { %9234 = vmatprep.subr.mxu0 %v9928_v0  ;;  %9251 = vmatprep.mubr.msk.f32.mxu1 %vm9929_vm0, %v9928_v0 }
 0x5fd   : > { %9227 = vmatmul.mubr.f32.vlgmr.msra.gmra.mxu0 %v2682_v57 }
 0x5fe   : > { %9235 = vmatpush3.xpose.msra.mxu0 %v2724_v50  ;;  %9236 = vmatprep.mubr.msk.f32.mxu0 %vm9929_vm0, %v9928_v0 }
 0x5ff   : > { %9244 = vmatprep.subr.mxu0 %v9928_v0 }
 0x601   : > { %9237 = vmatmul.mubr.f32.vlgmr.msra.gmra.mxu0 %v2681_v53 }
 0x602   : > { %9246 = vmatprep.mubr.msk.f32.mxu0 %vm9929_vm0, %v9928_v0 }
 0x6a5   : > { %v2309_v63 = vpop.f32.mrf.mxu1 }
 0x6a7   : > { %v9193_v1 = vpop.f32.mrf.mxu1 }
 0x6a9   : > { %v2457_v2 = vpop.f32.mrf.mxu1 }
 0x6ab   : > { %v9203_v3 = vpop.f32.mrf.mxu1 }
 0x6ad   : > { %v2233_v4 = vpop.f32.mrf.mxu0  ;;  %v2603_v5 = vpop.f32.mrf.mxu1 }
 0x6ae   : > { %v2310_v6 = vadd.f32 %v2309_v63, %v2233_v4 }
 0x6af   : > { %v9188_v7 = vpop.f32.mrf.mxu0  ;;  %v9213_v8 = vpop.f32.mrf.mxu1 }
 0x6b1   : > { %v2383_v9 = vpop.f32.mrf.mxu0  ;;  %v2763_v10 = vpop.f32.mrf.mxu1 }
 0x6b2   : > { %v2384_v11 = vadd.f32 %v2383_v9, %v2310_v6 }
 0x6b3   : > { %v9198_v13 = vpop.f32.mrf.mxu0  ;;  %v9223_v14 = vpop.f32.mrf.mxu1 }
 0x6b4   : > { %v2458_v15 = vadd.f32 %v2457_v2, %v2384_v11 }
 0x6b5   : > { %v2531_v16 = vpop.f32.mrf.mxu0  ;;  %v2911_v17 = vpop.f32.mrf.mxu1 }
 0x6b6   : > { %v2532_v18 = vadd.f32 %v2531_v16, %v2458_v15 }
 0x6b7   : > { %v9208_v19 = vpop.f32.mrf.mxu0  ;;  %v9233_v20 = vpop.f32.mrf.mxu1 }
 0x6b8   : > { %v10328_v21 = vadd.f32 %v2603_v5, %v2532_v18 }
 0x6b9   : > { %v2687_v22 = vpop.f32.mrf.mxu0  ;;  %v3057_v23 = vpop.f32.mrf.mxu1 }
 0x6ba   : > { %v2764_v26 = vadd.f32 %v2763_v10, %v2687_v22 }
 0x6bb   : > { %v9218_v24 = vpop.f32.mrf.mxu0  ;;  %v9243_v25 = vpop.f32.mrf.mxu1 }
 0x6bd   : > { %v2837_v27 = vpop.f32.mrf.mxu0 }
 0x6be   : > { %v2838_v28 = vadd.f32 %v2837_v27, %v2764_v26 }
 0x6bf   : > { %v9228_v29 = vpop.f32.mrf.mxu0 }
 0x6c0   : > { %v2912_v30 = vadd.f32 %v2911_v17, %v2838_v28 }
 0x6c1   : > { %v2985_v31 = vpop.f32.mrf.mxu0 }
 0x6c2   : > { %v2986_v32 = vadd.f32 %v2985_v31, %v2912_v30 }
 0x6c3   : > { %v9238_v33 = vpop.f32.mrf.mxu0 }
 0x6c4   : > { %v3058_v34 = vadd.f32 %v3057_v23, %v2986_v32 }
 0x6c6   : > { %v3061_v35 = vmul.f32 0.5, %v3058_v34 }
 0x6c8   : > { %v3062_v36 = vsel %vm1225_vm3, %v3061_v35, -inf }
 0x6c9   : > { %3063 = vmax.xlane.f32.xlu1 %v3062_v36 }
 0x6da   : > { %3073 = vrot.lane.b32.xlu1 %v10199_v49, %s9937_s28  ;;  %s9951_s28 = smov 100  }
 0x6de   : > { %3527 = vrot.lane.b32.xlu1 %v10199_v49, %s9938_s7  ;;  %s9952_s7 = smov 12  }
 0x6e2   : > { %3525 = vrot.lane.b32.xlu1 %v10199_v49, %s9939_s9  ;;  %s9953_s9 = smov 36  }
 0x752   : > { %v3064_v37 = vpop.xlane.xlu1 %3063 }
 0x753   : > { %v3065_v38 = vsub.f32 %v3061_v35, %v3064_v37 }
 0x755   : > { %v3066_v39 = vmul.f32 1.442695, %v3065_v38 }
 0x756   : > { %v3074_v40 = vpop.permute.xlu1 %3073 }
 0x757   : > { %9749 = vpow2.f32 %v3066_v39  ;;  %v3110_v41 = vand.u32 4294901760, %v3074_v40 }
 0x759   : > { %v3187_v42 = vsub.f32 %v3074_v40, %v3110_v41  ;;  %9245 = vmatpush3.msra.mxu0 %v3110_v41 }
 0x75a   : > { %9254 = vmatprep.subr.mxu0 %v9928_v0  ;;  %v3528_v50 = vpop.permute.xlu1 %3527 }
 0x75b   : > { %v3188_v43 = vand.u32 4294901760, %v3187_v42  ;;  %v3531_v51 = vsel %vm773_vm2, %v3528_v50, 0 }
 0x75c   : > { %v3564_v52 = vand.u32 4294901760, %v3531_v51 }
 0x75d   : > { %v3189_v44 = vsub.f32 %v3187_v42, %v3188_v43 }
 0x75e   : > { %v3641_v54 = vsub.f32 %v3531_v51, %v3564_v52  ;;  %v3526_v56 = vpop.permute.xlu1 %3525 }
 0x75f   : > { %v3190_v45 = vand.u32 4294901760, %v3189_v44  ;;  %v3529_v60 = vsel %vm773_vm2, %v3526_v56, 0 }
 0x760   : > { %v3642_v59 = vand.u32 4294901760, %v3641_v54  ;;  %v3599_v62 = vand.u32 4294901760, %v3529_v60 }
 0x761   : > { %9250 = vmatpush3.msra.mxu1 %v3190_v45 }
 0x762   : > { %9259 = vmatprep.subr.mxu1 %v9928_v0  ;;  %v3643_v1 = vsub.f32 %v3641_v54, %v3642_v59  ;;  %v3600_v3 = vsub.f32 %v3529_v60, %v3599_v62 }
 0x764   : > { %v9750_v46 = vpop.eup %9749  ;;  %v3644_v5 = vand.u32 4294901760, %v3643_v1  ;;  %v3601_v6 = vand.u32 4294901760, %v3600_v3 }
 0x765   : > { %v3068_v47 = vsel %vm1225_vm3, %v9750_v46, 0.0 }
 0x766   : > { %3069 = vadd.xlane.f32.xlu0 %v3068_v47  ;;  %v3602_v7 = vsub.f32 %v3600_v3, %v3601_v6 }
 0x768   : > { %v3603_v8 = vand.u32 4294901760, %v3602_v7 }
 0x7ef   : > { %v3070_v48 = vpop.xlane.xlu0 %3069 }
 0x7f0   : > { %9751 = vrcp.f32 %v3070_v48 }
 0x7fd   : > { %v9752_v53 = vpop.eup %9751 }
 0x7fe   : > { %v3072_v55 = vmul.f32 %v9752_v53, %v9750_v46 }
 0x800   : > { %v3077_v57 = vsel %vm1225_vm3, %v3072_v55, 0 }
 0x801   : > { %v3145_v58 = vand.u32 4294901760, %v3077_v57 }
 0x803   : > { %v3146_v61 = vsub.f32 %v3077_v57, %v3145_v58  ;;  %9252 = vmatmul.mubr.f32.vlgmr.msra.gmra.mxu1 %v3145_v58 }
 0x804   : > { %9260 = vmatpush3.msra.mxu1 %v3110_v41  ;;  %9261 = vmatprep.mubr.msk.f32.mxu1 %vm9929_vm0, %v9928_v0 }
 0x805   : > { %9269 = vmatprep.subr.mxu1 %v9928_v0  ;;  %v3147_v63 = vand.u32 4294901760, %v3146_v61 }
 0x807   : > { %9262 = vmatmul.mubr.f32.vlgmr.msra.gmra.mxu1 %v3147_v63  ;;  %v3148_v2 = vsub.f32 %v3146_v61, %v3147_v63 }
 0x808   : > { %9270 = vmatpush3.msra.mxu1 %v3110_v41  ;;  %9271 = vmatprep.mubr.msk.f32.mxu1 %vm9929_vm0, %v9928_v0 }
 0x809   : > { %9279 = vmatprep.subr.mxu1 %v9928_v0  ;;  %v3149_v4 = vand.u32 4294901760, %v3148_v2 }
 0x80b   : > { %9247 = vmatmul.mubr.f32.vlgmr.msra.gmra.mxu0 %v3149_v4  ;;  %9272 = vmatmul.mubr.f32.vlgmr.msra.gmra.mxu1 %v3145_v58 }
 0x80c   : > { %9255 = vmatpush3.msra.mxu0 %v3187_v42  ;;  %9280 = vmatpush3.xpose.msra.mxu1 %v3644_v5 }
 0x80d   : > { %9256 = vmatprep.mubr.msk.f32.mxu0 %vm9929_vm0, %v9928_v0  ;;  %9264 = vmatprep.subr.mxu0 %v9928_v0 }
 0x80e   : > { %9281 = vmatprep.mubr.msk.f32.mxu1 %vm9929_vm0, %v9928_v0  ;;  %9289 = vmatprep.subr.mxu1 %v9928_v0 }
 0x80f   : > { %9257 = vmatmul.mubr.f32.vlgmr.msra.gmra.mxu0 %v3146_v61  ;;  %9282 = vmatmul.mubr.f32.vlgmr.msra.gmra.mxu1 %v3599_v62 }
 0x810   : > { %9265 = vmatpush3.msra.mxu0 %v3188_v43  ;;  %9290 = vmatpush3.xpose.msra.mxu1 %v3564_v52 }
 0x811   : > { %9266 = vmatprep.mubr.msk.f32.mxu0 %vm9929_vm0, %v9928_v0  ;;  %9274 = vmatprep.subr.mxu0 %v9928_v0 }
 0x812   : > { %9291 = vmatprep.mubr.msk.f32.mxu1 %vm9929_vm0, %v9928_v0  ;;  %9299 = vmatprep.subr.mxu1 %v9928_v0 }
 0x813   : > { %9267 = vmatmul.mubr.f32.vlgmr.msra.gmra.mxu0 %v3145_v58  ;;  %9292 = vmatmul.mubr.f32.vlgmr.msra.gmra.mxu1 %v3601_v6 }
 0x814   : > { %9275 = vmatpush3.xpose.msra.mxu0 %v3564_v52  ;;  %9300 = vmatpush3.xpose.msra.mxu1 %v3564_v52 }
 0x815   : > { %9276 = vmatprep.mubr.msk.f32.mxu0 %vm9929_vm0, %v9928_v0  ;;  %9284 = vmatprep.subr.mxu0 %v9928_v0 }
 0x816   : > { %9301 = vmatprep.mubr.msk.f32.mxu1 %vm9929_vm0, %v9928_v0  ;;  %9309 = vmatprep.subr.mxu1 %v9928_v0 }
 0x817   : > { %9277 = vmatmul.mubr.f32.vlgmr.msra.gmra.mxu0 %v3603_v8  ;;  %9302 = vmatmul.mubr.f32.vlgmr.msra.gmra.mxu1 %v3599_v62 }
 0x818   : > { %9285 = vmatpush3.xpose.msra.mxu0 %v3641_v54  ;;  %9286 = vmatprep.mubr.msk.f32.mxu0 %vm9929_vm0, %v9928_v0 }
 0x819   : > { %9294 = vmatprep.subr.mxu0 %v9928_v0  ;;  %9311 = vmatprep.mubr.msk.f32.mxu1 %vm9929_vm0, %v9928_v0 }
 0x81b   : > { %9287 = vmatmul.mubr.f32.vlgmr.msra.gmra.mxu0 %v3600_v3 }
 0x81c   : > { %9295 = vmatpush3.xpose.msra.mxu0 %v3642_v59  ;;  %9296 = vmatprep.mubr.msk.f32.mxu0 %vm9929_vm0, %v9928_v0 }
 0x81d   : > { %9304 = vmatprep.subr.mxu0 %v9928_v0 }
 0x81f   : > { %9297 = vmatmul.mubr.f32.vlgmr.msra.gmra.mxu0 %v3599_v62 }
 0x820   : > { %9306 = vmatprep.mubr.msk.f32.mxu0 %vm9929_vm0, %v9928_v0 }
 0x8c3   : > { %v3227_v9 = vpop.f32.mrf.mxu1 }
 0x8c5   : > { %v9253_v10 = vpop.f32.mrf.mxu1 }
 0x8c7   : > { %v3375_v11 = vpop.f32.mrf.mxu1 }
 0x8c9   : > { %v9263_v13 = vpop.f32.mrf.mxu1 }
 0x8cb   : > { %v3151_v14 = vpop.f32.mrf.mxu0  ;;  %v3521_v15 = vpop.f32.mrf.mxu1 }
 0x8cc   : > { %v3228_v16 = vadd.f32 %v3227_v9, %v3151_v14 }
 0x8cd   : > { %v9248_v17 = vpop.f32.mrf.mxu0  ;;  %v9273_v18 = vpop.f32.mrf.mxu1 }
 0x8cf   : > { %v3301_v19 = vpop.f32.mrf.mxu0  ;;  %v3681_v20 = vpop.f32.mrf.mxu1 }
 0x8d0   : > { %v3302_v22 = vadd.f32 %v3301_v19, %v3228_v16 }
 0x8d1   : > { %v9258_v23 = vpop.f32.mrf.mxu0  ;;  %v9283_v24 = vpop.f32.mrf.mxu1 }
 0x8d2   : > { %v3376_v25 = vadd.f32 %v3375_v11, %v3302_v22 }
 0x8d3   : > { %v3449_v26 = vpop.f32.mrf.mxu0  ;;  %v3829_v27 = vpop.f32.mrf.mxu1 }
 0x8d4   : > { %v3450_v28 = vadd.f32 %v3449_v26, %v3376_v25 }
 0x8d5   : > { %v9268_v29 = vpop.f32.mrf.mxu0  ;;  %v9293_v30 = vpop.f32.mrf.mxu1 }
 0x8d6   : > { %v10374_v31 = vadd.f32 %v3521_v15, %v3450_v28 }
 0x8d7   : > { %v3605_v32 = vpop.f32.mrf.mxu0  ;;  %v3975_v33 = vpop.f32.mrf.mxu1 }
 0x8d8   : > { %v3682_v36 = vadd.f32 %v3681_v20, %v3605_v32 }
 0x8d9   : > { %v9278_v34 = vpop.f32.mrf.mxu0  ;;  %v9303_v35 = vpop.f32.mrf.mxu1 }
 0x8db   : > { %v3755_v37 = vpop.f32.mrf.mxu0 }
 0x8dc   : > { %v3756_v38 = vadd.f32 %v3755_v37, %v3682_v36 }
 0x8dd   : > { %v9288_v39 = vpop.f32.mrf.mxu0 }
 0x8de   : > { %v3830_v40 = vadd.f32 %v3829_v27, %v3756_v38 }
 0x8df   : > { %v3903_v41 = vpop.f32.mrf.mxu0 }
 0x8e0   : > { %v3904_v42 = vadd.f32 %v3903_v41, %v3830_v40 }
 0x8e1   : > { %v9298_v43 = vpop.f32.mrf.mxu0 }
 0x8e2   : > { %v3976_v44 = vadd.f32 %v3975_v33, %v3904_v42 }
 0x8e4   : > { %v3979_v45 = vmul.f32 0.5, %v3976_v44 }
 0x8e6   : > { %v3980_v46 = vsel %vm1225_vm3, %v3979_v45, -inf }
 0x8e7   : > { %3981 = vmax.xlane.f32.xlu1 %v3980_v46 }
 0x970   : > { %v3982_v47 = vpop.xlane.xlu1 %3981 }
 0x971   : > { %v3983_v48 = vsub.f32 %v3979_v45, %v3982_v47 }
 0x973   : > { %v3984_v50 = vmul.f32 1.442695, %v3983_v48 }
 0x975   : > { %9753 = vpow2.f32 %v3984_v50 }
 0x982   : > { %v9754_v51 = vpop.eup %9753 }
 0x983   : > { %v3986_v52 = vsel %vm1225_vm3, %v9754_v51, 0.0 }
 0x984   : > { %3987 = vadd.xlane.f32.xlu0 %v3986_v52 }
 0x99a   : > { %3991 = vrot.lane.b32.xlu0 %v10199_v49, %s9940_s16  ;;  %s9954_s16 = smov 4  }
 0x99e   : > { %4445 = vrot.lane.b32.xlu0 %v10199_v49, %s9941_s17  ;;  %s9955_s17 = smov 8  }
 0x9a2   : > { %4443 = vrot.lane.b32.xlu0 %v10199_v49, %s9942_s24  ;;  %s9956_s24 = smov 16  }
 0xa0d   : > { %v3988_v53 = vpop.xlane.xlu0 %3987 }
 0xa0e   : > { %9755 = vrcp.f32 %v3988_v53 }
 0xa11   : > { %v3992_v54 = vpop.permute.xlu0 %3991 }
 0xa12   : > { %v4028_v55 = vand.u32 4294901760, %v3992_v54 }
 0xa14   : > { %v4105_v56 = vsub.f32 %v3992_v54, %v4028_v55  ;;  %9305 = vmatpush3.msra.mxu0 %v4028_v55 }
 0xa15   : > { %v4446_v57 = vpop.permute.xlu0 %4445  ;;  %9314 = vmatprep.subr.mxu0 %v9928_v0 }
 0xa16   : > { %v4106_v58 = vand.u32 4294901760, %v4105_v56  ;;  %v4449_v59 = vsel %vm773_vm2, %v4446_v57, 0 }
 0xa17   : > { %v4482_v61 = vand.u32 4294901760, %v4449_v59 }
 0xa18   : > { %v4107_v60 = vsub.f32 %v4105_v56, %v4106_v58 }
 0xa19   : > { %v4559_v1 = vsub.f32 %v4449_v59, %v4482_v61  ;;  %v4444_v3 = vpop.permute.xlu0 %4443 }
 0xa1a   : > { %v4108_v62 = vand.u32 4294901760, %v4107_v60  ;;  %v4447_v7 = vsel %vm773_vm2, %v4444_v3, 0 }
 0xa1b   : > { %v9756_v63 = vpop.eup %9755  ;;  %v4560_v6 = vand.u32 4294901760, %v4559_v1  ;;  %v4517_v9 = vand.u32 4294901760, %v4447_v7 }
 0xa1c   : > { %9310 = vmatpush3.msra.mxu1 %v4108_v62  ;;  %v3990_v2 = vmul.f32 %v9756_v63, %v9754_v51 }
 0xa1d   : > { %9319 = vmatprep.subr.mxu1 %v9928_v0  ;;  %v4561_v11 = vsub.f32 %v4559_v1, %v4560_v6  ;;  %v4518_v14 = vsub.f32 %v4447_v7, %v4517_v9 }
 0xa1e   : > { %v3995_v4 = vsel %vm1225_vm3, %v3990_v2, 0 }
 0xa1f   : > { %v4063_v5 = vand.u32 4294901760, %v3995_v4  ;;  %v4562_v16 = vand.u32 4294901760, %v4561_v11  ;;  %v4519_v17 = vand.u32 4294901760, %v4518_v14 }
 0xa21   : > { %v4064_v8 = vsub.f32 %v3995_v4, %v4063_v5  ;;  %9312 = vmatmul.mubr.f32.vlgmr.msra.gmra.mxu1 %v4063_v5  ;;  %v4520_v18 = vsub.f32 %v4518_v14, %v4519_v17 }
 0xa22   : > { %9320 = vmatpush3.msra.mxu1 %v4028_v55  ;;  %9321 = vmatprep.mubr.msk.f32.mxu1 %vm9929_vm0, %v9928_v0 }
 0xa23   : > { %9329 = vmatprep.subr.mxu1 %v9928_v0  ;;  %v4065_v10 = vand.u32 4294901760, %v4064_v8  ;;  %v4521_v19 = vand.u32 4294901760, %v4520_v18 }
 0xa25   : > { %9322 = vmatmul.mubr.f32.vlgmr.msra.gmra.mxu1 %v4065_v10  ;;  %v4066_v13 = vsub.f32 %v4064_v8, %v4065_v10 }
 0xa26   : > { %9330 = vmatpush3.msra.mxu1 %v4028_v55  ;;  %9331 = vmatprep.mubr.msk.f32.mxu1 %vm9929_vm0, %v9928_v0 }
 0xa27   : > { %9339 = vmatprep.subr.mxu1 %v9928_v0  ;;  %v4067_v15 = vand.u32 4294901760, %v4066_v13 }
 0xa29   : > { %9307 = vmatmul.mubr.f32.vlgmr.msra.gmra.mxu0 %v4067_v15  ;;  %9332 = vmatmul.mubr.f32.vlgmr.msra.gmra.mxu1 %v4063_v5 }
 0xa2a   : > { %9315 = vmatpush3.msra.mxu0 %v4105_v56  ;;  %9340 = vmatpush3.xpose.msra.mxu1 %v4562_v16 }
 0xa2b   : > { %9316 = vmatprep.mubr.msk.f32.mxu0 %vm9929_vm0, %v9928_v0  ;;  %9324 = vmatprep.subr.mxu0 %v9928_v0 }
 0xa2c   : > { %9341 = vmatprep.mubr.msk.f32.mxu1 %vm9929_vm0, %v9928_v0  ;;  %9349 = vmatprep.subr.mxu1 %v9928_v0 }
 0xa2d   : > { %9317 = vmatmul.mubr.f32.vlgmr.msra.gmra.mxu0 %v4064_v8  ;;  %9342 = vmatmul.mubr.f32.vlgmr.msra.gmra.mxu1 %v4517_v9 }
 0xa2e   : > { %9325 = vmatpush3.msra.mxu0 %v4106_v58  ;;  %9350 = vmatpush3.xpose.msra.mxu1 %v4482_v61 }
 0xa2f   : > { %9326 = vmatprep.mubr.msk.f32.mxu0 %vm9929_vm0, %v9928_v0  ;;  %9334 = vmatprep.subr.mxu0 %v9928_v0 }
 0xa30   : > { %9351 = vmatprep.mubr.msk.f32.mxu1 %vm9929_vm0, %v9928_v0  ;;  %9359 = vmatprep.subr.mxu1 %v9928_v0 }
 0xa31   : > { %9327 = vmatmul.mubr.f32.vlgmr.msra.gmra.mxu0 %v4063_v5  ;;  %9352 = vmatmul.mubr.f32.vlgmr.msra.gmra.mxu1 %v4519_v17 }
 0xa32   : > { %9335 = vmatpush3.xpose.msra.mxu0 %v4482_v61  ;;  %9360 = vmatpush3.xpose.msra.mxu1 %v4482_v61 }
 0xa33   : > { %9336 = vmatprep.mubr.msk.f32.mxu0 %vm9929_vm0, %v9928_v0  ;;  %9344 = vmatprep.subr.mxu0 %v9928_v0 }
 0xa34   : > { %9361 = vmatprep.mubr.msk.f32.mxu1 %vm9929_vm0, %v9928_v0  ;;  %9369 = vmatprep.subr.mxu1 %v9928_v0 }
 0xa35   : > { %9337 = vmatmul.mubr.f32.vlgmr.msra.gmra.mxu0 %v4521_v19  ;;  %9362 = vmatmul.mubr.f32.vlgmr.msra.gmra.mxu1 %v4517_v9 }
 0xa36   : > { %9345 = vmatpush3.xpose.msra.mxu0 %v4559_v1  ;;  %9346 = vmatprep.mubr.msk.f32.mxu0 %vm9929_vm0, %v9928_v0 }
 0xa37   : > { %9354 = vmatprep.subr.mxu0 %v9928_v0  ;;  %9371 = vmatprep.mubr.msk.f32.mxu1 %vm9929_vm0, %v9928_v0 }
 0xa39   : > { %9347 = vmatmul.mubr.f32.vlgmr.msra.gmra.mxu0 %v4518_v14 }
 0xa3a   : > { %9355 = vmatpush3.xpose.msra.mxu0 %v4560_v6  ;;  %9356 = vmatprep.mubr.msk.f32.mxu0 %vm9929_vm0, %v9928_v0 }
 0xa3b   : > { %9364 = vmatprep.subr.mxu0 %v9928_v0 }
 0xa3d   : > { %9357 = vmatmul.mubr.f32.vlgmr.msra.gmra.mxu0 %v4517_v9 }
 0xa3e   : > { %9366 = vmatprep.mubr.msk.f32.mxu0 %vm9929_vm0, %v9928_v0 }
 0xae1   : > { %v4145_v20 = vpop.f32.mrf.mxu1 }
 0xae3   : > { %v9313_v22 = vpop.f32.mrf.mxu1 }
 0xae5   : > { %v4293_v23 = vpop.f32.mrf.mxu1 }
 0xae7   : > { %v9323_v24 = vpop.f32.mrf.mxu1 }
 0xae9   : > { %v4069_v25 = vpop.f32.mrf.mxu0  ;;  %v4439_v26 = vpop.f32.mrf.mxu1 }
 0xaea   : > { %v4146_v27 = vadd.f32 %v4145_v20, %v4069_v25 }
 0xaeb   : > { %v9308_v28 = vpop.f32.mrf.mxu0  ;;  %v9333_v29 = vpop.f32.mrf.mxu1 }
 0xaed   : > { %v4219_v30 = vpop.f32.mrf.mxu0  ;;  %v4599_v32 = vpop.f32.mrf.mxu1 }
 0xaee   : > { %v4220_v33 = vadd.f32 %v4219_v30, %v4146_v27 }
 0xaef   : > { %v9318_v34 = vpop.f32.mrf.mxu0  ;;  %v9343_v35 = vpop.f32.mrf.mxu1 }
 0xaf0   : > { %v4294_v36 = vadd.f32 %v4293_v23, %v4220_v33 }
 0xaf1   : > { %v4367_v37 = vpop.f32.mrf.mxu0  ;;  %v4747_v38 = vpop.f32.mrf.mxu1 }
 0xaf2   : > { %v4368_v39 = vadd.f32 %v4367_v37, %v4294_v36 }
 0xaf3   : > { %v9328_v40 = vpop.f32.mrf.mxu0  ;;  %v9353_v41 = vpop.f32.mrf.mxu1 }
 0xaf4   : > { %v10420_v42 = vadd.f32 %v4439_v26, %v4368_v39 }
 0xaf5   : > { %v4523_v43 = vpop.f32.mrf.mxu0  ;;  %v4893_v44 = vpop.f32.mrf.mxu1 }
 0xaf6   : > { %v4600_v47 = vadd.f32 %v4599_v32, %v4523_v43 }
 0xaf7   : > { %v9338_v45 = vpop.f32.mrf.mxu0  ;;  %v9363_v46 = vpop.f32.mrf.mxu1 }
 0xaf9   : > { %v4673_v48 = vpop.f32.mrf.mxu0 }
 0xafa   : > { %v4674_v50 = vadd.f32 %v4673_v48, %v4600_v47 }
 0xafb   : > { %v9348_v51 = vpop.f32.mrf.mxu0 }
 0xafc   : > { %v4748_v52 = vadd.f32 %v4747_v38, %v4674_v50 }
 0xafd   : > { %v4821_v53 = vpop.f32.mrf.mxu0 }
 0xafe   : > { %v4822_v54 = vadd.f32 %v4821_v53, %v4748_v52 }
 0xaff   : > { %v9358_v55 = vpop.f32.mrf.mxu0 }
 0xb00   : > { %v4894_v56 = vadd.f32 %v4893_v44, %v4822_v54 }
 0xb02   : > { %v4897_v57 = vmul.f32 0.5, %v4894_v56 }
 0xb04   : > { %v4898_v58 = vsel %vm1225_vm3, %v4897_v57, -inf }
 0xb05   : > { %4899 = vmax.xlane.f32.xlu1 %v4898_v58 }
 0xb16   : > { %4909 = vrot.lane.b32.xlu1 %v10199_v49, %s9943_s26  ;;  %s9957_s26 = smov 20  }
 0xb1a   : > { %5363 = vrot.lane.b32.xlu1 %v10199_v49, %s9944_s8  ;;  %s9958_s8 = smov 24  }
 0xb1e   : > { %5361 = vrot.lane.b32.xlu1 %v10199_v49, %s9945_s10  ;;  %s9959_s10 = smov 28  }
 0xb8e   : > { %v4900_v59 = vpop.xlane.xlu1 %4899 }
 0xb8f   : > { %v4901_v60 = vsub.f32 %v4897_v57, %v4900_v59 }
 0xb91   : > { %v4902_v61 = vmul.f32 1.442695, %v4901_v60 }
 0xb92   : > { %v4910_v62 = vpop.permute.xlu1 %4909 }
 0xb93   : > { %9757 = vpow2.f32 %v4902_v61  ;;  %v4946_v63 = vand.u32 4294901760, %v4910_v62 }
 0xb95   : > { %v5023_v1 = vsub.f32 %v4910_v62, %v4946_v63  ;;  %9365 = vmatpush3.msra.mxu0 %v4946_v63 }
 0xb96   : > { %9374 = vmatprep.subr.mxu0 %v9928_v0  ;;  %v5364_v8 = vpop.permute.xlu1 %5363 }
 0xb97   : > { %v5024_v2 = vand.u32 4294901760, %v5023_v1  ;;  %v5367_v9 = vsel %vm773_vm2, %v5364_v8, 0 }
 0xb98   : > { %v5400_v10 = vand.u32 4294901760, %v5367_v9 }
 0xb99   : > { %v5025_v3 = vsub.f32 %v5023_v1, %v5024_v2 }
 0xb9a   : > { %v5477_v13 = vsub.f32 %v5367_v9, %v5400_v10  ;;  %v5362_v15 = vpop.permute.xlu1 %5361 }
 0xb9b   : > { %v5026_v4 = vand.u32 4294901760, %v5025_v3  ;;  %v5365_v19 = vsel %vm773_vm2, %v5362_v15, 0 }
 0xb9c   : > { %v5478_v18 = vand.u32 4294901760, %v5477_v13  ;;  %v5435_v22 = vand.u32 4294901760, %v5365_v19 }
 0xb9d   : > { %9370 = vmatpush3.msra.mxu1 %v5026_v4 }
 0xb9e   : > { %9379 = vmatprep.subr.mxu1 %v9928_v0  ;;  %v5479_v24 = vsub.f32 %v5477_v13, %v5478_v18  ;;  %v5436_v26 = vsub.f32 %v5365_v19, %v5435_v22 }
 0xba0   : > { %v9758_v5 = vpop.eup %9757  ;;  %v5480_v28 = vand.u32 4294901760, %v5479_v24  ;;  %v5437_v29 = vand.u32 4294901760, %v5436_v26 }
 0xba1   : > { %v4904_v6 = vsel %vm1225_vm3, %v9758_v5, 0.0 }
 0xba2   : > { %4905 = vadd.xlane.f32.xlu0 %v4904_v6  ;;  %v5438_v30 = vsub.f32 %v5436_v26, %v5437_v29 }
 0xba4   : > { %v5439_v32 = vand.u32 4294901760, %v5438_v30 }
 0xc2b   : > { %v4906_v7 = vpop.xlane.xlu0 %4905 }
 0xc2c   : > { %9759 = vrcp.f32 %v4906_v7 }
 0xc39   : > { %v9760_v11 = vpop.eup %9759 }
 0xc3a   : > { %v4908_v14 = vmul.f32 %v9760_v11, %v9758_v5 }
 0xc3c   : > { %v4913_v16 = vsel %vm1225_vm3, %v4908_v14, 0 }
 0xc3d   : > { %v4981_v17 = vand.u32 4294901760, %v4913_v16 }
 0xc3f   : > { %v4982_v20 = vsub.f32 %v4913_v16, %v4981_v17  ;;  %9372 = vmatmul.mubr.f32.vlgmr.msra.gmra.mxu1 %v4981_v17 }
 0xc40   : > { %9380 = vmatpush3.msra.mxu1 %v4946_v63  ;;  %9381 = vmatprep.mubr.msk.f32.mxu1 %vm9929_vm0, %v9928_v0 }
 0xc41   : > { %9389 = vmatprep.subr.mxu1 %v9928_v0  ;;  %v4983_v23 = vand.u32 4294901760, %v4982_v20 }
 0xc43   : > { %9382 = vmatmul.mubr.f32.vlgmr.msra.gmra.mxu1 %v4983_v23  ;;  %v4984_v25 = vsub.f32 %v4982_v20, %v4983_v23 }
 0xc44   : > { %9390 = vmatpush3.msra.mxu1 %v4946_v63  ;;  %9391 = vmatprep.mubr.msk.f32.mxu1 %vm9929_vm0, %v9928_v0 }
 0xc45   : > { %9399 = vmatprep.subr.mxu1 %v9928_v0  ;;  %v4985_v27 = vand.u32 4294901760, %v4984_v25 }
 0xc47   : > { %9367 = vmatmul.mubr.f32.vlgmr.msra.gmra.mxu0 %v4985_v27  ;;  %9392 = vmatmul.mubr.f32.vlgmr.msra.gmra.mxu1 %v4981_v17 }
 0xc48   : > { %9375 = vmatpush3.msra.mxu0 %v5023_v1  ;;  %9400 = vmatpush3.xpose.msra.mxu1 %v5480_v28 }
 0xc49   : > { %9376 = vmatprep.mubr.msk.f32.mxu0 %vm9929_vm0, %v9928_v0  ;;  %9384 = vmatprep.subr.mxu0 %v9928_v0 }
 0xc4a   : > { %9401 = vmatprep.mubr.msk.f32.mxu1 %vm9929_vm0, %v9928_v0  ;;  %9409 = vmatprep.subr.mxu1 %v9928_v0 }
 0xc4b   : > { %9377 = vmatmul.mubr.f32.vlgmr.msra.gmra.mxu0 %v4982_v20  ;;  %9402 = vmatmul.mubr.f32.vlgmr.msra.gmra.mxu1 %v5435_v22 }
 0xc4c   : > { %9385 = vmatpush3.msra.mxu0 %v5024_v2  ;;  %9410 = vmatpush3.xpose.msra.mxu1 %v5400_v10 }
 0xc4d   : > { %9386 = vmatprep.mubr.msk.f32.mxu0 %vm9929_vm0, %v9928_v0  ;;  %9394 = vmatprep.subr.mxu0 %v9928_v0 }
 0xc4e   : > { %9411 = vmatprep.mubr.msk.f32.mxu1 %vm9929_vm0, %v9928_v0  ;;  %9419 = vmatprep.subr.mxu1 %v9928_v0 }
 0xc4f   : > { %9387 = vmatmul.mubr.f32.vlgmr.msra.gmra.mxu0 %v4981_v17  ;;  %9412 = vmatmul.mubr.f32.vlgmr.msra.gmra.mxu1 %v5437_v29 }
 0xc50   : > { %9395 = vmatpush3.xpose.msra.mxu0 %v5400_v10  ;;  %9420 = vmatpush3.xpose.msra.mxu1 %v5400_v10 }
 0xc51   : > { %9396 = vmatprep.mubr.msk.f32.mxu0 %vm9929_vm0, %v9928_v0  ;;  %9404 = vmatprep.subr.mxu0 %v9928_v0 }
 0xc52   : > { %9421 = vmatprep.mubr.msk.f32.mxu1 %vm9929_vm0, %v9928_v0  ;;  %9429 = vmatprep.subr.mxu1 %v9928_v0 }
 0xc53   : > { %9397 = vmatmul.mubr.f32.vlgmr.msra.gmra.mxu0 %v5439_v32  ;;  %9422 = vmatmul.mubr.f32.vlgmr.msra.gmra.mxu1 %v5435_v22 }
 0xc54   : > { %9405 = vmatpush3.xpose.msra.mxu0 %v5477_v13  ;;  %9406 = vmatprep.mubr.msk.f32.mxu0 %vm9929_vm0, %v9928_v0 }
 0xc55   : > { %9414 = vmatprep.subr.mxu0 %v9928_v0  ;;  %9431 = vmatprep.mubr.msk.f32.mxu1 %vm9929_vm0, %v9928_v0 }
 0xc57   : > { %9407 = vmatmul.mubr.f32.vlgmr.msra.gmra.mxu0 %v5436_v26 }
 0xc58   : > { %9415 = vmatpush3.xpose.msra.mxu0 %v5478_v18  ;;  %9416 = vmatprep.mubr.msk.f32.mxu0 %vm9929_vm0, %v9928_v0 }
 0xc59   : > { %9424 = vmatprep.subr.mxu0 %v9928_v0 }
 0xc5b   : > { %9417 = vmatmul.mubr.f32.vlgmr.msra.gmra.mxu0 %v5435_v22 }
 0xc5c   : > { %9426 = vmatprep.mubr.msk.f32.mxu0 %vm9929_vm0, %v9928_v0 }
 0xcff   : > { %v5063_v33 = vpop.f32.mrf.mxu1 }
 0xd01   : > { %v9373_v34 = vpop.f32.mrf.mxu1 }
 0xd03   : > { %v5211_v35 = vpop.f32.mrf.mxu1 }
 0xd05   : > { %v9383_v36 = vpop.f32.mrf.mxu1 }
 0xd07   : > { %v4987_v37 = vpop.f32.mrf.mxu0  ;;  %v5357_v38 = vpop.f32.mrf.mxu1 }
 0xd08   : > { %v5064_v39 = vadd.f32 %v5063_v33, %v4987_v37 }
 0xd09   : > { %v9368_v40 = vpop.f32.mrf.mxu0  ;;  %v9393_v41 = vpop.f32.mrf.mxu1 }
 0xd0b   : > { %v5137_v43 = vpop.f32.mrf.mxu0  ;;  %v5517_v44 = vpop.f32.mrf.mxu1 }
 0xd0c   : > { %v5138_v45 = vadd.f32 %v5137_v43, %v5064_v39 }
 0xd0d   : > { %v9378_v46 = vpop.f32.mrf.mxu0  ;;  %v9403_v47 = vpop.f32.mrf.mxu1 }
 0xd0e   : > { %v5212_v48 = vadd.f32 %v5211_v35, %v5138_v45 }
 0xd0f   : > { %v5285_v50 = vpop.f32.mrf.mxu0  ;;  %v5665_v51 = vpop.f32.mrf.mxu1 }
 0xd10   : > { %v5286_v52 = vadd.f32 %v5285_v50, %v5212_v48 }
 0xd11   : > { %v9388_v53 = vpop.f32.mrf.mxu0  ;;  %v9413_v54 = vpop.f32.mrf.mxu1 }
 0xd12   : > { %v10466_v55 = vadd.f32 %v5357_v38, %v5286_v52 }
 0xd13   : > { %v5441_v56 = vpop.f32.mrf.mxu0  ;;  %v5811_v57 = vpop.f32.mrf.mxu1 }
 0xd14   : > { %v5518_v60 = vadd.f32 %v5517_v44, %v5441_v56 }
 0xd15   : > { %v9398_v58 = vpop.f32.mrf.mxu0  ;;  %v9423_v59 = vpop.f32.mrf.mxu1 }
 0xd17   : > { %v5591_v61 = vpop.f32.mrf.mxu0 }
 0xd18   : > { %v5592_v62 = vadd.f32 %v5591_v61, %v5518_v60 }
 0xd19   : > { %v9408_v63 = vpop.f32.mrf.mxu0 }
 0xd1a   : > { %v5666_v1 = vadd.f32 %v5665_v51, %v5592_v62 }
 0xd1b   : > { %v5739_v2 = vpop.f32.mrf.mxu0 }
 0xd1c   : > { %v5740_v3 = vadd.f32 %v5739_v2, %v5666_v1 }
 0xd1d   : > { %v9418_v4 = vpop.f32.mrf.mxu0 }
 0xd1e   : > { %v5812_v5 = vadd.f32 %v5811_v57, %v5740_v3 }
 0xd20   : > { %v5815_v6 = vmul.f32 0.5, %v5812_v5 }
 0xd22   : > { %v5816_v7 = vsel %vm1225_vm3, %v5815_v6, -inf }
 0xd23   : > { %5817 = vmax.xlane.f32.xlu1 %v5816_v7 }
 0xdac   : > { %v5818_v8 = vpop.xlane.xlu1 %5817 }
 0xdad   : > { %v5819_v9 = vsub.f32 %v5815_v6, %v5818_v8 }
 0xdaf   : > { %v5820_v10 = vmul.f32 1.442695, %v5819_v9 }
 0xdb1   : > { %9761 = vpow2.f32 %v5820_v10 }
 0xdbe   : > { %v9762_v11 = vpop.eup %9761 }
 0xdbf   : > { %v5822_v13 = vsel %vm1225_vm3, %v9762_v11, 0.0 }
 0xdc0   : > { %5823 = vadd.xlane.f32.xlu0 %v5822_v13 }
 0xdd6   : > { %5827 = vrot.lane.b32.xlu0 %v10199_v49, %s9946_s11 }
 0xdda   : > { %6281 = vrot.lane.b32.xlu0 %v10199_v49, %s9947_s12 }
 0xdde   : > { %6279 = vrot.lane.b32.xlu0 %v10199_v49, %s9948_s30  ;;  %s8773_s30 = sshll.u32 %s10012_s22, 7  ;;  %s9960_s22 = smov [#allocation8]  }
 0xe49   : > { %v5824_v14 = vpop.xlane.xlu0 %5823 }
 0xe4a   : > { %9763 = vrcp.f32 %v5824_v14 }
 0xe4d   : > { %v5828_v15 = vpop.permute.xlu0 %5827 }
 0xe4e   : > { %v5864_v16 = vand.u32 4294901760, %v5828_v15 }
 0xe50   : > { %v5941_v17 = vsub.f32 %v5828_v15, %v5864_v16  ;;  %9425 = vmatpush3.msra.mxu0 %v5864_v16 }
 0xe51   : > { %v6282_v18 = vpop.permute.xlu0 %6281  ;;  %9434 = vmatprep.subr.mxu0 %v9928_v0 }
 0xe52   : > { %v5942_v19 = vand.u32 4294901760, %v5941_v17  ;;  %v6285_v20 = vsel %vm773_vm2, %v6282_v18, 0 }
 0xe53   : > { %v6318_v23 = vand.u32 4294901760, %v6285_v20 }
 0xe54   : > { %v5943_v22 = vsub.f32 %v5941_v17, %v5942_v19 }
 0xe55   : > { %v6395_v26 = vsub.f32 %v6285_v20, %v6318_v23  ;;  %v6280_v28 = vpop.permute.xlu0 %6279 }
 0xe56   : > { %v5944_v24 = vand.u32 4294901760, %v5943_v22  ;;  %v6283_v33 = vsel %vm773_vm2, %v6280_v28, 0 }
 0xe57   : > { %v9764_v25 = vpop.eup %9763  ;;  %v6396_v32 = vand.u32 4294901760, %v6395_v26  ;;  %v6353_v35 = vand.u32 4294901760, %v6283_v33 }
 0xe58   : > { %9430 = vmatpush3.msra.mxu1 %v5944_v24  ;;  %v5826_v27 = vmul.f32 %v9764_v25, %v9762_v11 }
 0xe59   : > { %9439 = vmatprep.subr.mxu1 %v9928_v0  ;;  %v6397_v37 = vsub.f32 %v6395_v26, %v6396_v32  ;;  %v6354_v39 = vsub.f32 %v6283_v33, %v6353_v35 }
 0xe5a   : > { %v5831_v29 = vsel %vm1225_vm3, %v5826_v27, 0 }
 0xe5b   : > { %v5899_v30 = vand.u32 4294901760, %v5831_v29  ;;  %v6398_v41 = vand.u32 4294901760, %v6397_v37  ;;  %v6355_v43 = vand.u32 4294901760, %v6354_v39 }
 0xe5d   : > { %v5900_v34 = vsub.f32 %v5831_v29, %v5899_v30  ;;  %9432 = vmatmul.mubr.f32.vlgmr.msra.gmra.mxu1 %v5899_v30  ;;  %v6356_v44 = vsub.f32 %v6354_v39, %v6355_v43 }
 0xe5e   : > { %9440 = vmatpush3.msra.mxu1 %v5864_v16  ;;  %9441 = vmatprep.mubr.msk.f32.mxu1 %vm9929_vm0, %v9928_v0 }
 0xe5f   : > { %9449 = vmatprep.subr.mxu1 %v9928_v0  ;;  %v5901_v36 = vand.u32 4294901760, %v5900_v34  ;;  %v6357_v45 = vand.u32 4294901760, %v6356_v44 }
 0xe61   : > { %9442 = vmatmul.mubr.f32.vlgmr.msra.gmra.mxu1 %v5901_v36  ;;  %v5902_v38 = vsub.f32 %v5900_v34, %v5901_v36 }
 0xe62   : > { %9450 = vmatpush3.msra.mxu1 %v5864_v16  ;;  %9451 = vmatprep.mubr.msk.f32.mxu1 %vm9929_vm0, %v9928_v0 }
 0xe63   : > { %9459 = vmatprep.subr.mxu1 %v9928_v0  ;;  %v5903_v40 = vand.u32 4294901760, %v5902_v38 }
 0xe65   : > { %9427 = vmatmul.mubr.f32.vlgmr.msra.gmra.mxu0 %v5903_v40  ;;  %9452 = vmatmul.mubr.f32.vlgmr.msra.gmra.mxu1 %v5899_v30 }
 0xe66   : > { %9435 = vmatpush3.msra.mxu0 %v5941_v17  ;;  %9460 = vmatpush3.xpose.msra.mxu1 %v6398_v41 }
 0xe67   : > { %9436 = vmatprep.mubr.msk.f32.mxu0 %vm9929_vm0, %v9928_v0  ;;  %9444 = vmatprep.subr.mxu0 %v9928_v0 }
 0xe68   : > { %9461 = vmatprep.mubr.msk.f32.mxu1 %vm9929_vm0, %v9928_v0  ;;  %9469 = vmatprep.subr.mxu1 %v9928_v0 }
 0xe69   : > { %9437 = vmatmul.mubr.f32.vlgmr.msra.gmra.mxu0 %v5900_v34  ;;  %9462 = vmatmul.mubr.f32.vlgmr.msra.gmra.mxu1 %v6353_v35 }
 0xe6a   : > { %9445 = vmatpush3.msra.mxu0 %v5942_v19  ;;  %9470 = vmatpush3.xpose.msra.mxu1 %v6318_v23 }
 0xe6b   : > { %9446 = vmatprep.mubr.msk.f32.mxu0 %vm9929_vm0, %v9928_v0  ;;  %9454 = vmatprep.subr.mxu0 %v9928_v0 }
 0xe6c   : > { %9471 = vmatprep.mubr.msk.f32.mxu1 %vm9929_vm0, %v9928_v0  ;;  %9479 = vmatprep.subr.mxu1 %v9928_v0 }
 0xe6d   : > { %9447 = vmatmul.mubr.f32.vlgmr.msra.gmra.mxu0 %v5899_v30  ;;  %9472 = vmatmul.mubr.f32.vlgmr.msra.gmra.mxu1 %v6355_v43 }
 0xe6e   : > { %9455 = vmatpush3.xpose.msra.mxu0 %v6318_v23  ;;  %9480 = vmatpush3.xpose.msra.mxu1 %v6318_v23 }
 0xe6f   : > { %9456 = vmatprep.mubr.msk.f32.mxu0 %vm9929_vm0, %v9928_v0  ;;  %9464 = vmatprep.subr.mxu0 %v9928_v0 }
 0xe70   : > { %9481 = vmatprep.mubr.msk.f32.mxu1 %vm9929_vm0, %v9928_v0  ;;  %9489 = vmatprep.subr.mxu1 %v9928_v0 }
 0xe71   : > { %9457 = vmatmul.mubr.f32.vlgmr.msra.gmra.mxu0 %v6357_v45  ;;  %9482 = vmatmul.mubr.f32.vlgmr.msra.gmra.mxu1 %v6353_v35 }
 0xe72   : > { %9465 = vmatpush3.xpose.msra.mxu0 %v6395_v26  ;;  %9466 = vmatprep.mubr.msk.f32.mxu0 %vm9929_vm0, %v9928_v0 }
 0xe73   : > { %9474 = vmatprep.subr.mxu0 %v9928_v0  ;;  %9491 = vmatprep.mubr.msk.f32.mxu1 %vm9929_vm0, %v9928_v0 }
 0xe75   : > { %9467 = vmatmul.mubr.f32.vlgmr.msra.gmra.mxu0 %v6354_v39 }
 0xe76   : > { %9475 = vmatpush3.xpose.msra.mxu0 %v6396_v32  ;;  %9476 = vmatprep.mubr.msk.f32.mxu0 %vm9929_vm0, %v9928_v0 }
 0xe77   : > { %9484 = vmatprep.subr.mxu0 %v9928_v0 }
 0xe79   : > { %9477 = vmatmul.mubr.f32.vlgmr.msra.gmra.mxu0 %v6353_v35 }
 0xe7a   : > { %9486 = vmatprep.mubr.msk.f32.mxu0 %vm9929_vm0, %v9928_v0 }
 0xf1d   : > { %v5981_v46 = vpop.f32.mrf.mxu1 }
 0xf1f   : > { %v9433_v47 = vpop.f32.mrf.mxu1 }
 0xf21   : > { %v6129_v48 = vpop.f32.mrf.mxu1 }
 0xf23   : > { %v9443_v50 = vpop.f32.mrf.mxu1 }
 0xf25   : > { %v5905_v51 = vpop.f32.mrf.mxu0  ;;  %v6275_v52 = vpop.f32.mrf.mxu1 }
 0xf26   : > { %v5982_v53 = vadd.f32 %v5981_v46, %v5905_v51 }
 0xf27   : > { %v9428_v54 = vpop.f32.mrf.mxu0  ;;  %v9453_v56 = vpop.f32.mrf.mxu1 }
 0xf29   : > { %v6055_v57 = vpop.f32.mrf.mxu0  ;;  %v6435_v58 = vpop.f32.mrf.mxu1 }
 0xf2a   : > { %v6056_v59 = vadd.f32 %v6055_v57, %v5982_v53 }
 0xf2b   : > { %v9438_v60 = vpop.f32.mrf.mxu0  ;;  %v9463_v61 = vpop.f32.mrf.mxu1 }
 0xf2c   : > { %v6130_v62 = vadd.f32 %v6129_v48, %v6056_v59 }
 0xf2d   : > { %v6203_v63 = vpop.f32.mrf.mxu0  ;;  %v6583_v1 = vpop.f32.mrf.mxu1 }
 0xf2e   : > { %v6204_v2 = vadd.f32 %v6203_v63, %v6130_v62 }
 0xf2f   : > { %v9448_v3 = vpop.f32.mrf.mxu0  ;;  %v9473_v4 = vpop.f32.mrf.mxu1 }
 0xf30   : > { %v10512_v5 = vadd.f32 %v6275_v52, %v6204_v2 }
 0xf31   : > { %v6359_v6 = vpop.f32.mrf.mxu0  ;;  %v6729_v7 = vpop.f32.mrf.mxu1 }
 0xf32   : > { %v6436_v10 = vadd.f32 %v6435_v58, %v6359_v6 }
 0xf33   : > { %v9458_v8 = vpop.f32.mrf.mxu0  ;;  %v9483_v9 = vpop.f32.mrf.mxu1 }
 0xf35   : > { %v6509_v11 = vpop.f32.mrf.mxu0 }
 0xf36   : > { %v6510_v13 = vadd.f32 %v6509_v11, %v6436_v10 }
 0xf37   : > { %v9468_v14 = vpop.f32.mrf.mxu0 }
 0xf38   : > { %v6584_v15 = vadd.f32 %v6583_v1, %v6510_v13 }
 0xf39   : > { %v6657_v16 = vpop.f32.mrf.mxu0 }
 0xf3a   : > { %v6658_v17 = vadd.f32 %v6657_v16, %v6584_v15 }
 0xf3b   : > { %v9478_v18 = vpop.f32.mrf.mxu0 }
 0xf3c   : > { %v6730_v19 = vadd.f32 %v6729_v7, %v6658_v17 }
 0xf3e   : > { %v6733_v20 = vmul.f32 0.5, %v6730_v19 }
 0xf40   : > { %v6734_v22 = vsel %vm1225_vm3, %v6733_v20, -inf }
 0xf41   : > { %6735 = vmax.xlane.f32.xlu1 %v6734_v22 }
 0xf52   : > { %6745 = vrot.lane.b32.xlu1 %v10199_v49, %s9949_s29  ;;  %s268_s29 = scalar_lea.vmem [#allocation8], %s8766_s14 }
 0xf56   : > { %7199 = vrot.lane.b32.xlu1 %v10199_v49, %s9950_s6  ;;  %s8669_s6 = sshll.u32 %s268_s29, 4  ;;  %s8670_s6 = int_to_ptr.vmem [resolvable:$true] %s8669_s6 }
 0xf5a   : > { %7197 = vrot.lane.b32.xlu1 %v10199_v49, %s9951_s28 }
 0xfca   : > { %v6736_v23 = vpop.xlane.xlu1 %6735 }
 0xfcb   : > { %v6737_v24 = vsub.f32 %v6733_v20, %v6736_v23 }
 0xfcd   : > { %v6738_v25 = vmul.f32 1.442695, %v6737_v24 }
 0xfce   : > { %v6746_v26 = vpop.permute.xlu1 %6745 }
 0xfcf   : > { %9765 = vpow2.f32 %v6738_v25  ;;  %v6782_v27 = vand.u32 4294901760, %v6746_v26 }
 0xfd1   : > { %v6859_v28 = vsub.f32 %v6746_v26, %v6782_v27  ;;  %9485 = vmatpush3.msra.mxu0 %v6782_v27 }
 0xfd2   : > { %9494 = vmatprep.subr.mxu0 %v9928_v0  ;;  %v7200_v36 = vpop.permute.xlu1 %7199 }
 0xfd3   : > { %v6860_v29 = vand.u32 4294901760, %v6859_v28  ;;  %v7203_v37 = vsel %vm773_vm2, %v7200_v36, 0 }
 0xfd4   : > { %v7236_v38 = vand.u32 4294901760, %v7203_v37 }
 0xfd5   : > { %v6861_v30 = vsub.f32 %v6859_v28, %v6860_v29 }
 0xfd6   : > { %v7313_v40 = vsub.f32 %v7203_v37, %v7236_v38  ;;  %v7198_v43 = vpop.permute.xlu1 %7197 }
 0xfd7   : > { %v6862_v32 = vand.u32 4294901760, %v6861_v30  ;;  %v7201_v47 = vsel %vm773_vm2, %v7198_v43, 0 }
 0xfd8   : > { %v7314_v46 = vand.u32 4294901760, %v7313_v40  ;;  %v7271_v50 = vand.u32 4294901760, %v7201_v47 }
 0xfd9   : > { %9490 = vmatpush3.msra.mxu1 %v6862_v32 }
 0xfda   : > { %9499 = vmatprep.subr.mxu1 %v9928_v0  ;;  %v7315_v52 = vsub.f32 %v7313_v40, %v7314_v46  ;;  %v7272_v54 = vsub.f32 %v7201_v47, %v7271_v50 }
 0xfdc   : > { %v9766_v33 = vpop.eup %9765  ;;  %v7316_v57 = vand.u32 4294901760, %v7315_v52  ;;  %v7273_v58 = vand.u32 4294901760, %v7272_v54 }
 0xfdd   : > { %v6740_v34 = vsel %vm1225_vm3, %v9766_v33, 0.0 }
 0xfde   : > { %6741 = vadd.xlane.f32.xlu0 %v6740_v34  ;;  %v7274_v59 = vsub.f32 %v7272_v54, %v7273_v58 }
 0xfe0   : > { %v7275_v60 = vand.u32 4294901760, %v7274_v59 }
0x1067   : > { %v6742_v35 = vpop.xlane.xlu0 %6741 }
0x1068   : > { %9767 = vrcp.f32 %v6742_v35 }
0x1075   : > { %v9768_v39 = vpop.eup %9767 }
0x1076   : > { %v6744_v41 = vmul.f32 %v9768_v39, %v9766_v33 }
0x1078   : > { %v6749_v44 = vsel %vm1225_vm3, %v6744_v41, 0 }
0x1079   : > { %v6817_v45 = vand.u32 4294901760, %v6749_v44 }
0x107b   : > { %v6818_v48 = vsub.f32 %v6749_v44, %v6817_v45  ;;  %9492 = vmatmul.mubr.f32.vlgmr.msra.gmra.mxu1 %v6817_v45 }
0x107c   : > { %9500 = vmatpush3.msra.mxu1 %v6782_v27  ;;  %9501 = vmatprep.mubr.msk.f32.mxu1 %vm9929_vm0, %v9928_v0 }
0x107d   : > { %9509 = vmatprep.subr.mxu1 %v9928_v0  ;;  %v6819_v51 = vand.u32 4294901760, %v6818_v48 }
0x107f   : > { %9502 = vmatmul.mubr.f32.vlgmr.msra.gmra.mxu1 %v6819_v51  ;;  %v6820_v53 = vsub.f32 %v6818_v48, %v6819_v51 }
0x1080   : > { %9510 = vmatpush3.msra.mxu1 %v6782_v27  ;;  %9511 = vmatprep.mubr.msk.f32.mxu1 %vm9929_vm0, %v9928_v0 }
0x1081   : > { %9519 = vmatprep.subr.mxu1 %v9928_v0  ;;  %v6821_v56 = vand.u32 4294901760, %v6820_v53 }
0x1083   : > { %9487 = vmatmul.mubr.f32.vlgmr.msra.gmra.mxu0 %v6821_v56  ;;  %9512 = vmatmul.mubr.f32.vlgmr.msra.gmra.mxu1 %v6817_v45  ;;  %v8157_v56 = vld [vmem:[#allocation7 + $0x10] sm:$0xff] }
0x1084   : > { %9495 = vmatpush3.msra.mxu0 %v6859_v28  ;;  %9520 = vmatpush3.xpose.msra.mxu1 %v7316_v57 }
0x1085   : > { %9496 = vmatprep.mubr.msk.f32.mxu0 %vm9929_vm0, %v9928_v0  ;;  %9504 = vmatprep.subr.mxu0 %v9928_v0 }
0x1086   : > { %9521 = vmatprep.mubr.msk.f32.mxu1 %vm9929_vm0, %v9928_v0  ;;  %9529 = vmatprep.subr.mxu1 %v9928_v0 }
0x1087   : > { %9497 = vmatmul.mubr.f32.vlgmr.msra.gmra.mxu0 %v6818_v48  ;;  %9522 = vmatmul.mubr.f32.vlgmr.msra.gmra.mxu1 %v7271_v50 }
0x1088   : > { %9505 = vmatpush3.msra.mxu0 %v6860_v29  ;;  %9530 = vmatpush3.xpose.msra.mxu1 %v7236_v38 }
0x1089   : > { %9506 = vmatprep.mubr.msk.f32.mxu0 %vm9929_vm0, %v9928_v0  ;;  %9514 = vmatprep.subr.mxu0 %v9928_v0 }
0x108a   : > { %9531 = vmatprep.mubr.msk.f32.mxu1 %vm9929_vm0, %v9928_v0  ;;  %9539 = vmatprep.subr.mxu1 %v9928_v0 }
0x108b   : > { %9507 = vmatmul.mubr.f32.vlgmr.msra.gmra.mxu0 %v6817_v45  ;;  %9532 = vmatmul.mubr.f32.vlgmr.msra.gmra.mxu1 %v7273_v58  ;;  %v10587_v58 = vand.u32 4294901760, %v8157_v56 }
0x108c   : > { %9515 = vmatpush3.xpose.msra.mxu0 %v7236_v38  ;;  %9540 = vmatpush3.xpose.msra.mxu1 %v7236_v38 }
0x108d   : > { %9516 = vmatprep.mubr.msk.f32.mxu0 %vm9929_vm0, %v9928_v0  ;;  %9524 = vmatprep.subr.mxu0 %v9928_v0 }
0x108e   : > { %9541 = vmatprep.mubr.msk.f32.mxu1 %vm9929_vm0, %v9928_v0  ;;  %9549 = vmatprep.subr.mxu1 %v9928_v0 }
0x108f   : > { %9517 = vmatmul.mubr.f32.vlgmr.msra.gmra.mxu0 %v7275_v60  ;;  %9542 = vmatmul.mubr.f32.vlgmr.msra.gmra.mxu1 %v7271_v50  ;;  %v10593_v60 = vsub.f32 %v8157_v56, %v10587_v58 }
0x1090   : > { %9525 = vmatpush3.xpose.msra.mxu0 %v7313_v40  ;;  %9526 = vmatprep.mubr.msk.f32.mxu0 %vm9929_vm0, %v9928_v0 }
0x1091   : > { %9534 = vmatprep.subr.mxu0 %v9928_v0  ;;  %9551 = vmatprep.mubr.msk.f32.mxu1 %vm9929_vm0, %v9928_v0 }
0x1093   : > { %9527 = vmatmul.mubr.f32.vlgmr.msra.gmra.mxu0 %v7272_v54  ;;  %v8158_v54 = vld [vmem:[#allocation7 + $0x18] sm:$0xff] }
0x1094   : > { %9535 = vmatpush3.xpose.msra.mxu0 %v7314_v46  ;;  %9536 = vmatprep.mubr.msk.f32.mxu0 %vm9929_vm0, %v9928_v0  ;;  %v10585_v57 = vand.u32 4294901760, %v8158_v54 }
0x1095   : > { %9544 = vmatprep.subr.mxu0 %v9928_v0 }
0x1096   : > { %v10590_v59 = vsub.f32 %v8158_v54, %v10585_v57 }
0x1097   : > { %9537 = vmatmul.mubr.f32.vlgmr.msra.gmra.mxu0 %v7271_v50 }
0x1098   : > { %9546 = vmatprep.mubr.msk.f32.mxu0 %vm9929_vm0, %v9928_v0 }
0x113b   : > { %v6899_v61 = vpop.f32.mrf.mxu1 }
0x113d   : > { %v9493_v62 = vpop.f32.mrf.mxu1 }
0x113e   : > { %v8282_v62 = vand.u32 4294901760, %v10593_v60 }
0x113f   : > { %v7047_v63 = vpop.f32.mrf.mxu1 }
0x1141   : > { %v9503_v1 = vpop.f32.mrf.mxu1 }
0x1142   : > { %v8283_v1 = vsub.f32 %v10593_v60, %v8282_v62 }
0x1143   : > { %v6823_v2 = vpop.f32.mrf.mxu0  ;;  %v7193_v3 = vpop.f32.mrf.mxu1 }
0x1144   : > { %v6900_v4 = vadd.f32 %v6899_v61, %v6823_v2  ;;  %v8275_v61 = vand.u32 4294901760, %v10590_v59 }
0x1145   : > { %v9488_v6 = vpop.f32.mrf.mxu0  ;;  %v9513_v7 = vpop.f32.mrf.mxu1 }
0x1147   : > { %v6973_v8 = vpop.f32.mrf.mxu0  ;;  %v7353_v9 = vpop.f32.mrf.mxu1 }
0x1148   : > { %v6974_v10 = vadd.f32 %v6973_v8, %v6900_v4  ;;  %v8156_v4 = vld [vmem:[#allocation7 + $0x8] sm:$0xff]  ;;  %v8155_v8 = vld [vmem:[#allocation7] sm:$0xff] }
0x1149   : > { %v9498_v11 = vpop.f32.mrf.mxu0  ;;  %v9523_v13 = vpop.f32.mrf.mxu1  ;;  %v10609_v6 = vand.u32 4294901760, %v8156_v4 }
0x114a   : > { %v7048_v14 = vadd.f32 %v7047_v63, %v6974_v10  ;;  %v8276_v63 = vsub.f32 %v10590_v59, %v8275_v61  ;;  %v10614_v10 = vand.u32 4294901760, %v8155_v8 }
0x114b   : > { %v7121_v15 = vpop.f32.mrf.mxu0  ;;  %v7501_v16 = vpop.f32.mrf.mxu1 }
0x114c   : > { %v7122_v17 = vadd.f32 %v7121_v15, %v7048_v14  ;;  %v8277_v2 = vand.u32 4294901760, %v8276_v63  ;;  %v10620_v14 = vsub.f32 %v8155_v8, %v10614_v10 }
0x114d   : > { %v9508_v18 = vpop.f32.mrf.mxu0  ;;  %v9533_v19 = vpop.f32.mrf.mxu1 }
0x114e   : > { %v7194_v20 = vadd.f32 %v7193_v3, %v7122_v17  ;;  %v8284_v3 = vand.u32 4294901760, %v8283_v1  ;;  %v8296_v17 = vand.u32 4294901760, %v10620_v14 }
0x114f   : > { %v7277_v22 = vpop.f32.mrf.mxu0  ;;  %v7647_v23 = vpop.f32.mrf.mxu1 }
0x1150   : > { %v7354_v26 = vadd.f32 %v7353_v9, %v7277_v22  ;;  %v10612_v9 = vsub.f32 %v8156_v4, %v10609_v6 }
0x1151   : > { %v9518_v24 = vpop.f32.mrf.mxu0  ;;  %v9543_v25 = vpop.f32.mrf.mxu1 }
0x1152   : > { %v8289_v13 = vand.u32 4294901760, %v10612_v9 }
0x1153   : > { %v7427_v27 = vpop.f32.mrf.mxu0 }
0x1154   : > { %v7428_v28 = vadd.f32 %v7427_v27, %v7354_v26 }
0x1155   : > { %v9528_v29 = vpop.f32.mrf.mxu0 }
0x1156   : > { %v7502_v30 = vadd.f32 %v7501_v16, %v7428_v28  ;;  %v8290_v16 = vsub.f32 %v10612_v9, %v8289_v13 }
0x1157   : > { %v7575_v32 = vpop.f32.mrf.mxu0 }
0x1158   : > { %v7576_v33 = vadd.f32 %v7575_v32, %v7502_v30  ;;  %v8291_v19 = vand.u32 4294901760, %v8290_v16 }
0x1159   : > { %v9538_v34 = vpop.f32.mrf.mxu0 }
0x115a   : > { %v7648_v35 = vadd.f32 %v7647_v23, %v7576_v33 }
0x115c   : > { %v7651_v36 = vmul.f32 0.5, %v7648_v35 }
0x115e   : > { %v7652_v37 = vsel %vm1225_vm3, %v7651_v36, -inf }
0x115f   : > { %7653 = vmax.xlane.f32.xlu1 %v7652_v37 }
0x1170   : > { %8124 = vrot.lane.b32.xlu1 %v10420_v42, %s9952_s7 }
0x11e8   : > { %v7654_v38 = vpop.xlane.xlu1 %7653 }
0x11e9   : > { %v7655_v39 = vsub.f32 %v7651_v36, %v7654_v38 }
0x11eb   : > { %v7656_v40 = vmul.f32 1.442695, %v7655_v39 }
0x11ed   : > { %9769 = vpow2.f32 %v7656_v40 }
0x11fa   : > { %v9770_v41 = vpop.eup %9769 }
0x11fb   : > { %v7658_v43 = vsel %vm1225_vm3, %v9770_v41, 0.0 }
0x11fc   : > { %7659 = vadd.xlane.f32.xlu0 %v7658_v43 }
0x1212   : > { %7663 = vrot.lane.b32.xlu0 %v10199_v49, %s9953_s9  ;;  %s8667_s9 = scalar_lea.hbm %s10725_s5, %s8773_s30 }
0x1216   : > { %8116 = vrot.lane.b32.xlu0 %v10328_v21, %s9954_s16  ;;  %s8656_s16 = scalar_lea.sflag [#allocation4], %s10109_s13 }
0x121a   : > { %8120 = vrot.lane.b32.xlu0 %v10374_v31, %s9955_s17  ;;  %s9853_s17 = scalar_lea.vmem %s8670_s6, 128 }
0x121b   : > { %p9854_p11 = scmp.ne.s32.totalorder %s8670_s6, %s9853_s17 }
0x121d   : > { %p9855_p1 = pnand %p9854_p11, %p10741_p0 }
0x121e   : > { %8128 = vrot.lane.b32.xlu0 %v10466_v55, %s9956_s24  ;;  %s9857_s24 = sshll.u32 %s9960_s22, 4  ;;  %s9858_s24 = int_to_ptr.vmem [resolvable:$false] %s9857_s24 }
0x121f   : > { %p9856_p2 = pneg %p9855_p1  ;;  %s9859_s14 = scalar_lea.vmem %s9858_s24, 256 }
0x1220   : > { %p9860_p6 = scmp.lt.s32.totalorder %s8670_s6, %s9858_s24  ;;  %p9861_p12 = scmp.lt.s32.totalorder %s9859_s14, %s9853_s17 }
0x1222   : > { %8132 = vrot.lane.b32.xlu0 %v10512_v5, %s9957_s26  ;;  %p9862_p7 = por %p9861_p12, %p9860_p6 }
0x1224   : > { %p9863_p9 = pnand %p9862_p7, %p9856_p2 }
0x1226   : > { %8136 = vrot.lane.b32.xlu0 %v7194_v20, %s9958_s8  ;;  %v8297_v20 = vsub.f32 %v10620_v14, %v8296_v17 }
0x1228   : > { %v8298_v24 = vand.u32 4294901760, %v8297_v20 }
0x1285   : > { %v7660_v42 = vpop.xlane.xlu0 %7659 }
0x1286   : > { %9771 = vrcp.f32 %v7660_v42  ;;  %v8125_v42 = vpop.permute.xlu1 %8124 }
0x1289   : > { %v7664_v44 = vpop.permute.xlu0 %7663 }
0x128a   : > { %v7700_v45 = vand.u32 4294901760, %v7664_v44 }
0x128c   : > { %v7777_v46 = vsub.f32 %v7664_v44, %v7700_v45  ;;  %9545 = vmatpush3.msra.mxu0 %v7700_v45 }
0x128d   : > { %9554 = vmatprep.subr.mxu0 %v9928_v0  ;;  %v8117_v37 = vpop.permute.xlu0 %8116 }
0x128e   : > { %v7778_v49 = vand.u32 4294901760, %v7777_v46 }
0x1290   : > { %v7779_v21 = vsub.f32 %v7777_v46, %v7778_v49 }
0x1291   : > { %v8121_v38 = vpop.permute.xlu0 %8120 }
0x1292   : > { %v7780_v47 = vand.u32 4294901760, %v7779_v21 }
0x1293   : > { %v9772_v31 = vpop.eup %9771 }
0x1294   : > { %9550 = vmatpush3.msra.mxu1 %v7780_v47  ;;  %v7662_v48 = vmul.f32 %v9772_v31, %v9770_v41  ;;  %v8143_v41 = vsel %vm773_vm2, %v10282_v12, %v8117_v37 }
0x1295   : > { %9559 = vmatprep.subr.mxu1 %v9928_v0  ;;  %v8129_v39 = vpop.permute.xlu0 %8128  ;;  %v8144_v43 = vsel %vm1225_vm3, %v8143_v41, %v8121_v38 }
0x1296   : > { %v7667_v55 = vsel %vm1225_vm3, %v7662_v48, 0 }
0x1297   : > { %v7735_v5 = vand.u32 4294901760, %v7667_v55 }
0x1299   : > { %v7736_v50 = vsub.f32 %v7667_v55, %v7735_v5  ;;  %9552 = vmatmul.mubr.f32.vlgmr.msra.gmra.mxu1 %v7735_v5  ;;  %v8133_v40 = vpop.permute.xlu0 %8132 }
0x129a   : > { %9560 = vmatpush3.msra.mxu1 %v7700_v45  ;;  %9561 = vmatprep.mubr.msk.f32.mxu1 %vm9929_vm0, %v9928_v0 }
0x129b   : > { %9569 = vmatprep.subr.mxu1 %v9928_v0  ;;  %v7737_v51 = vand.u32 4294901760, %v7736_v50 }
0x129d   : > { %9562 = vmatmul.mubr.f32.vlgmr.msra.gmra.mxu1 %v7737_v51  ;;  %v7738_v52 = vsub.f32 %v7736_v50, %v7737_v51  ;;  %v8137_v44 = vpop.permute.xlu0 %8136 }
0x129e   : > { %9570 = vmatpush3.msra.mxu1 %v7700_v45  ;;  %9571 = vmatprep.mubr.msk.f32.mxu1 %vm9929_vm0, %v9928_v0  ;;  %v8146_v45 = vsel %vm8145_vm4, %v8144_v43, %v8125_v42 }
0x129f   : > { %v7739_v53 = vand.u32 4294901760, %v7738_v52  ;;  %9585 = vmatprep.subr.mxu1 %v9928_v0 }
0x12a1   : > { %9547 = vmatmul.mubr.f32.vlgmr.msra.gmra.mxu0 %v7739_v53  ;;  %9572 = vmatmul.mubr.f32.vlgmr.msra.gmra.mxu1 %v7735_v5 }
0x12a2   : > { %9555 = vmatpush3.msra.mxu0 %v7777_v46  ;;  %9556 = vmatprep.mubr.msk.f32.mxu0 %vm9929_vm0, %v9928_v0  ;;  %v8148_v46 = vsel %vm8147_vm5, %v8146_v45, %v8129_v39 }
0x12a3   : > { %9564 = vmatprep.subr.mxu0 %v9928_v0  ;;  %9593 = vmatprep.mubr.msk.f32.mxu1 %vm9929_vm0, %v9928_v0 }
0x12a4   : > { %9586 = vmatpush3.msra.mxu1 %v8277_v2 }
0x12a5   : > { %9557 = vmatmul.mubr.f32.vlgmr.msra.gmra.mxu0 %v7736_v50  ;;  %9587 = vmatprep.subr.mxu1 %v9928_v0 }
0x12a6   : > { %9565 = vmatpush3.msra.mxu0 %v7778_v49  ;;  %9566 = vmatprep.mubr.msk.f32.mxu0 %vm9929_vm0, %v9928_v0  ;;  %v8150_v49 = vsel %vm8149_vm6, %v8148_v46, %v8133_v40 }
0x12a7   : > { %9574 = vmatprep.subr.mxu0 %v9928_v0  ;;  %9588 = vmatpush3.msra.mxu1 %v8284_v3  ;;  %v8152_v21 = vsel %vm8151_vm7, %v8150_v49, %v8137_v44 }
0x12a8   : > { %9589 = vmatprep.subr.mxu1 %v9928_v0 }
0x12a9   : > { %9567 = vmatmul.mubr.f32.vlgmr.msra.gmra.mxu0 %v7735_v5  ;;  %9590 = vmatpush3.msra.mxu1 %v8291_v19 }
0x12aa   : > { %9582 = vmatprep.mubr.msk.f32.mxu0 %vm9929_vm0, %v9928_v0  ;;  %9575 = vmatpush3.msra.mxu0 %v10585_v57 }
0x12ab   : > { %9576 = vmatprep.subr.mxu0 %v9928_v0  ;;  %9591 = vmatprep.subr.mxu1 %v9928_v0 }
0x12ac   : > { %9577 = vmatpush3.msra.mxu0 %v10587_v58  ;;  %9592 = vmatpush3.msra.mxu1 %v8298_v24 }
0x12ad   : > { %9578 = vmatprep.subr.mxu0 %v9928_v0  ;;  %9607 = vmatprep.subr.mxu1 %v9928_v0 }
0x12ae   : > { %9579 = vmatpush3.msra.mxu0 %v10609_v6 }
0x12af   : > { %9580 = vmatprep.subr.mxu0 %v9928_v0 }
0x12b0   : > { %9581 = vmatpush3.msra.mxu0 %v10614_v10 }
0x12b1   : > { %9596 = vmatprep.subr.mxu0 %v9928_v0 }
0x1359   : > { %v7817_v7 = vpop.f32.mrf.mxu1 }
0x135b   : > { %v9553_v11 = vpop.f32.mrf.mxu1 }
0x135d   : > { %v7965_v15 = vpop.f32.mrf.mxu1 }
0x135f   : > { %v9563_v18 = vpop.f32.mrf.mxu1 }
0x1361   : > { %v7741_v22 = vpop.f32.mrf.mxu0  ;;  %v8111_v23 = vpop.f32.mrf.mxu1 }
0x1362   : > { %v7818_v27 = vadd.f32 %v7817_v7, %v7741_v22 }
0x1363   : > { %v9548_v25 = vpop.f32.mrf.mxu0  ;;  %v9573_v26 = vpop.f32.mrf.mxu1 }
0x1365   : > { %v7891_v28 = vpop.f32.mrf.mxu0 }
0x1366   : > { %v7892_v29 = vadd.f32 %v7891_v28, %v7818_v27 }
0x1367   : > { %v9558_v30 = vpop.f32.mrf.mxu0 }
0x1368   : > { %v7966_v32 = vadd.f32 %v7965_v15, %v7892_v29 }
0x1369   : > { %v8039_v33 = vpop.f32.mrf.mxu0 }
0x136a   : > { %v8040_v34 = vadd.f32 %v8039_v33, %v7966_v32 }
0x136b   : > { %v9568_v35 = vpop.f32.mrf.mxu0 }
0x136c   : > { %v8112_v36 = vadd.f32 %v8111_v23, %v8040_v34 }
0x136e   : > { %8140 = vrot.lane.b32.xlu0 %v8112_v36, %s9959_s10 }
0x13e0   : > { %v8141_v47 = vpop.permute.xlu0 %8140 }
0x13e1   : > { %v8154_v31 = vsel %vm8153_vm8, %v8152_v21, %v8141_v47 }
0x13e2   : > { %v8167_v48 = vsel %vm281_vm1, %v8154_v31, 0 }
0x13e3   : > { %v8238_v55 = vand.u32 4294901760, %v8167_v48 }
0x13e5   : > { %v8239_v5 = vsub.f32 %v8167_v48, %v8238_v55  ;;  %9594 = vmatmul.mubr.f32.vlgmr.msra.gmra.mxu1 %v8238_v55 }
0x13e6   : > { %9608 = vmatpush3.msra.mxu1 %v10585_v57  ;;  %9615 = vmatprep.mubr.msk.f32.mxu1 %vm9929_vm0, %v9928_v0 }
0x13e7   : > { %9609 = vmatprep.subr.mxu1 %v9928_v0  ;;  %v8240_v12 = vand.u32 4294901760, %v8239_v5 }
0x13e8   : > { %9610 = vmatpush3.msra.mxu1 %v10587_v58 }
0x13e9   : > { %9611 = vmatprep.subr.mxu1 %v9928_v0  ;;  %v8241_v50 = vsub.f32 %v8239_v5, %v8240_v12 }
0x13ea   : > { %9612 = vmatpush3.msra.mxu1 %v10609_v6 }
0x13eb   : > { %9613 = vmatprep.subr.mxu1 %v9928_v0  ;;  %v8242_v51 = vand.u32 4294901760, %v8241_v50 }
0x13ec   : > { %9614 = vmatpush3.msra.mxu1 %v10614_v10 }
0x13ed   : > { %9616 = vmatmul.mubr.f32.vlgmr.msra.gmra.mxu1 %v8240_v12  ;;  %9629 = vmatprep.subr.mxu1 %v9928_v0 }
0x13ee   : > { %9583 = vmatmul.mubr.f32.vlgmr.msra.gmra.mxu0 %v8242_v51  ;;  %9630 = vmatpush3.msra.mxu1 %v10585_v57 }
0x13ef   : > { %9597 = vmatpush3.msra.mxu0 %v10590_v59  ;;  %9631 = vmatprep.subr.mxu1 %v9928_v0  ;;  %v8771_v59 = vld [vmem:[%s10724_s4] ss:$0 sm:$0xff] }
0x13f0   : > { %9598 = vmatprep.subr.mxu0 %v9928_v0  ;;  %9632 = vmatpush3.msra.mxu1 %v10587_v58 }
0x13f1   : > { %9599 = vmatpush3.msra.mxu0 %v10593_v60  ;;  %9633 = vmatprep.subr.mxu1 %v9928_v0 }
0x13f2   : > { %9600 = vmatprep.subr.mxu0 %v9928_v0  ;;  %9634 = vmatpush3.msra.mxu1 %v10609_v6 }
0x13f3   : > { %9601 = vmatpush3.msra.mxu0 %v10612_v9  ;;  %9635 = vmatprep.subr.mxu1 %v9928_v0 }
0x13f4   : > { %9602 = vmatprep.subr.mxu0 %v9928_v0  ;;  %9604 = vmatprep.mubr.msk.f32.mxu0 %vm9929_vm0, %v9928_v0 }
0x13f5   : > { %9603 = vmatpush3.msra.mxu0 %v10620_v14  ;;  %9636 = vmatpush3.msra.mxu1 %v10614_v10 }
0x13f6   : > { %9637 = vmatprep.mubr.msk.f32.mxu1 %vm9929_vm0, %v9928_v0  ;;  %9605 = vmatmul.mubr.f32.vlgmr.msra.gmra.mxu0 %v8239_v5 }
0x13f7   : > { %9618 = vmatprep.subr.mxu0 %v9928_v0  ;;  %9638 = vmatmul.mubr.f32.vlgmr.msra.gmra.mxu1 %v8238_v55 }
0x13f8   : > { %9619 = vmatpush3.msra.mxu0 %v8275_v61  ;;  %9626 = vmatprep.mubr.msk.f32.mxu0 %vm9929_vm0, %v9928_v0 }
0x13f9   : > { %9620 = vmatprep.subr.mxu0 %v9928_v0 }
0x13fa   : > { %9621 = vmatpush3.msra.mxu0 %v8282_v62 }
0x13fb   : > { %9622 = vmatprep.subr.mxu0 %v9928_v0 }
0x13fc   : > { %9623 = vmatpush3.msra.mxu0 %v8289_v13 }
0x13fd   : > { %9624 = vmatprep.subr.mxu0 %v9928_v0 }
0x13fe   : > { %9625 = vmatpush3.msra.mxu0 %v8296_v17 }
0x13ff   : > { %9627 = vmatmul.mubr.f32.vlgmr.msra.gmra.mxu0 %v8238_v55 }
0x14a5   : > { %v8335_v52 = vpop.f32.mrf.mxu1 }
0x14a7   : > { %v9595_v53 = vpop.f32.mrf.mxu1 }
0x14ad   : > { %v8492_v54 = vpop.f32.mrf.mxu1 }
0x14ae   : > { %v8244_v56 = vpop.f32.mrf.mxu0 }
0x14af   : > { %v9617_v57 = vpop.f32.mrf.mxu1  ;;  %v8245_v60 = vadd.f32 %v8771_v59, %v8244_v56 }
0x14b0   : > { %v9584_v58 = vpop.f32.mrf.mxu0 }
0x14b1   : > { %v8336_v0 = vadd.f32 %v8335_v52, %v8245_v60 }
0x14b6   : > { %v8415_v61 = vpop.f32.mrf.mxu0 }
0x14b7   : > { %v8650_v62 = vpop.f32.mrf.mxu1  ;;  %v8416_v2 = vadd.f32 %v8415_v61, %v8336_v0 }
0x14b8   : > { %v9606_v63 = vpop.f32.mrf.mxu0 }
0x14b9   : > { %v9639_v1 = vpop.f32.mrf.mxu1  ;;  %v8493_v3 = vadd.f32 %v8492_v54, %v8416_v2 }
0x14bf   : > { %v8575_v4 = vpop.f32.mrf.mxu0 }
0x14c0   : > { %v8576_v6 = vadd.f32 %v8575_v4, %v8493_v3 }
0x14c1   : > { %v9628_v7 = vpop.f32.mrf.mxu0 }
0x14c2   : > { %v8651_v8 = vadd.f32 %v8650_v62, %v8576_v6 }
0x14c4   : > { %8654 = vst.msk [vmem:[%s268_s29] sm:$0xff] %vm281_vm1, %v8651_v8 }
0x14c5   : > { %9866 = shalt.err (!%p9863_p9)
}
0x14c6   : > { %s9867_s26 = scalar_lea.hbm %s8667_s9, 128  ;;  %s9871_s10 = scalar_lea.hbm %s10725_s5, 256 }
0x14c7   : > { %p9868_p13 = scmp.ne.s32.totalorder %s8667_s9, %s9867_s26  ;;  %p9872_p4 = scmp.lt.s32.totalorder %s8667_s9, %s10725_s5 }
0x14c8   : > { %p9873_p8 = scmp.lt.s32.totalorder %s9871_s10, %s9867_s26 }
0x14c9   : > { %p9869_p5 = pnand %p9868_p13, %p10741_p0 }
0x14ca   : > { %p9874_p3 = por %p9873_p8, %p9872_p4 }
0x14cb   : > { %p9870_p10 = pneg %p9869_p5 }
0x14cd   : > { %p9875_p11 = pnand %p9874_p3, %p9870_p10 }
0x14cf   : > { %9878 = shalt.err (!%p9875_p11)
}
0x14d0   : > { %9650 = dma.vmem_to_hbm [thread:$0]  (%p10741_p0), %s8670_s6, 128, %s8667_s9, %s8656_s16  }
0x14d1 PF: > { %s8681_s30 = sand.u32 1, %s9909_s18   ;;  %p10742_p1 = scmp.ne.s32.totalorder %s10731_s25, 0 }
0x14d2   : > { %p10743_p2 = scmp.ge.s32.totalorder %s9921_s21, 2  ;;  %s8682_s29 = scalar_lea.sflag [#allocation4], %s8681_s30 }
0x14d4   : > { %p9664_p6 = pnand %p10743_p2, %p10742_p1 }
0x14d6   : > { %p9665_p12 = pneg %p9664_p6 }
0x14d8   : > { %9904 = dma.done.wait (%p9665_p12), %s8682_s29, 128  }
0x14d9   : > { %9906 = vsyncadd (%p9665_p12), %s8682_s29, 4294967168  ;;  %p19_p7 = scmp.ge.s32.totalorder %s10063_s15, 4   ;;  %s10744_s18 = smov %s9913_s19 }
0x14da   : > { %s10745_s19 = smov %s9917_s20  ;;  %s10746_s20 = smov %s10079_s27 }
0x14db   : > { %s10747_s21 = smov %s10063_s15  ;;  %21 = sbr.rel (!%p19_p7) target bundleno = 6 (0x6), region = 93 }
0x14e0   :  { %8687 = vsyncpa [#allocation3], 1 }
0x14e1   :  { %8689 = vsyncpa [#allocation3 + $0x1], 1 }
0x14e2   :  { %8690 = vsyncpa [#allocation6], 1 }
0x14e3   :  { %8691 = vsyncpa [#allocation4], 1 }
0x14e4   :  { %8693 = vsyncpa [#allocation4 + $0x1], 1 }

</bundles_post_ra>
